<compile_context>
chip_gen: v6e
topology: v6e:2x2x1
jax: 0.10.0
libtpu: 0.0.40
codegen_flags: <defaults>
</compile_context>

<pallas_src>
import jax
import jax.numpy as jnp
from jax.experimental import pallas as pl
from jax.experimental.pallas import tpu as pltpu


def _round_up(x, m):
    return ((x + m - 1) // m) * m


def _pick_hidden_chunk(hidden):
    """Largest hidden chunk <= 2048 that is a multiple of 128 and divides `hidden`."""
    if hidden <= 2048:
        return hidden
    for th in (2048, 1024, 512, 256, 128):
        if hidden % th == 0:
            return th
    return hidden  # odd size: keep whole (block == full dim is always legal)


def _ffn_kernel(x_ref, w1_ref, b1_ref, w2_ref, b2_ref, o_ref, acc_ref):
    # grid = (row_tiles, hidden_chunks); hidden chunks are the reduction axis.
    k = pl.program_id(1)

    @pl.when(k == 0)
    def _init():
        acc_ref[...] = jnp.zeros_like(acc_ref)

    # linear1 chunk: MXU matmul with f32 accumulation, bias + ReLU kept in f32.
    h = jnp.dot(x_ref[...], w1_ref[...], preferred_element_type=jnp.float32)
    h = jnp.maximum(h + b1_ref[...], 0.0)
    # dropout: identity (eval mode).
    # TODO(synk): training-mode stochastic dropout via pltpu.prng_seed/prng_random_bits.

    # linear2 partial product for this hidden chunk, accumulated in f32.
    acc_ref[...] += jnp.dot(h.astype(w2_ref.dtype), w2_ref[...],
                            preferred_element_type=jnp.float32)

    @pl.when(k == pl.num_programs(1) - 1)
    def _finalize():
        o_ref[...] = (acc_ref[...] + b2_ref[...]).astype(o_ref.dtype)


def positionwise_feed_forward(x, w1, b1, w2, b2, *, compute_dtype=None, tm=None):
    """y = linear2(relu(linear1(x))), dropout = identity (eval mode).

    x: [B, S, d_model] -> [B, S, d_model].
    compute_dtype: dtype fed to the MXU for x/W1/W2 (e.g. jnp.bfloat16). The
    accumulation, bias add and ReLU stay in f32; output keeps x.dtype.
    """
    orig_dtype = x.dtype
    B, S, d_model = x.shape
    hidden = w1.shape[1]
    M = B * S

    if compute_dtype is None:
        compute_dtype = orig_dtype
    cbytes = jnp.dtype(compute_dtype).itemsize
    obytes = jnp.dtype(orig_dtype).itemsize

    # ---- row tile: large for MXU utilization; keep >= 2 steps for v7x megacore ----
    if tm is None:
        tm = 512 if cbytes <= 2 else 256
    tm = min(tm, _round_up(M, 8))
    if -(-M // tm) < 2 and M >= 256:
        tm = _round_up(-(-M // 2), 128)
    n_rows = -(-M // tm)
    M_pad = n_rows * tm

    # ---- hidden chunking (bounds resident weights + (tm, hidden) intermediate) ----
    th = _pick_hidden_chunk(hidden)
    n_k = hidden // th

    # ---- operands (cast inputs/weights to compute dtype; biases stay f32) ----
    x2 = x.reshape(M, d_model).astype(compute_dtype)
    if M_pad != M:
        x2 = jnp.pad(x2, ((0, M_pad - M), (0, 0)))
    w1c = w1.astype(compute_dtype)
    w2c = w2.astype(compute_dtype)
    b1f = b1.reshape(1, hidden).astype(jnp.float32)
    b2f = b2.reshape(1, d_model).astype(jnp.float32)

    # Single-buffer blocks whose index never changes (halves their VMEM footprint).
    const_mode = pl.Buffered(1) if n_k == 1 else None

    in_specs = [
        pl.BlockSpec((tm, d_model), lambda i, k: (i, 0)),                              # x rows
        pl.BlockSpec((d_model, th), lambda i, k: (0, k), pipeline_mode=const_mode),    # W1
        pl.BlockSpec((1, th), lambda i, k: (0, k), pipeline_mode=const_mode),          # b1
        pl.BlockSpec((th, d_model), lambda i, k: (k, 0), pipeline_mode=const_mode),    # W2
        pl.BlockSpec((1, d_model), lambda i, k: (0, 0), pipeline_mode=pl.Buffered(1)), # b2
    ]

    # ---- explicit VMEM limit: above the 16/32 MiB scoped default, below v7x's 64 MiB ----
    nbuf_w = 1 if n_k == 1 else 2
    vmem_need = (
        2 * tm * d_model * cbytes                 # x tiles (double buffered)
        + 2 * tm * d_model * obytes               # out tiles
        + nbuf_w * 2 * d_model * th * cbytes      # W1 + W2 chunks
        + nbuf_w * 8 * th * 4 + 8 * d_model * 4   # b1, b2 (sublane padded)
        + tm * d_model * 4                        # f32 accumulator scratch
        + tm * th * 4                             # f32 intermediate h
    )
    vmem_limit = int(min(max(2 * vmem_need, 32 * 1024 * 1024), 56 * 1024 * 1024))

    cost = pl.CostEstimate(
        flops=4 * M_pad * d_model * hidden,       # two matmuls, 2 flops/MAC each
        transcendentals=0,
        bytes_accessed=(M_pad * d_model * (cbytes + obytes)
                        + 2 * d_model * hidden * cbytes
                        + (hidden + d_model) * 4),
    )

    out = pl.pallas_call(
        _ffn_kernel,
        out_shape=jax.ShapeDtypeStruct((M_pad, d_model), orig_dtype),
        grid_spec=pltpu.PrefetchScalarGridSpec(
            num_scalar_prefetch=0,
            grid=(n_rows, n_k),
            in_specs=in_specs,
            out_specs=pl.BlockSpec((tm, d_model), lambda i, k: (i, 0)),
            scratch_shapes=[pltpu.VMEM((tm, d_model), jnp.float32)],
        ),
        compiler_params=pltpu.CompilerParams(
            dimension_semantics=("parallel", "arbitrary"),
            vmem_limit_bytes=vmem_limit,
        ),
        cost_estimate=cost,
    )(x2, w1c, b1f, w2c, b2f)

    if M_pad != M:
        out = out[:M]
    return out.reshape(B, S, d_model)


if __name__ == "__main__":
    # Small, 128-aligned shapes consistent with the module's forward:
    # x is [batch, seq, d_model]; S=200 (like the spec) exercises the row-padding path.
    B, S, d_model, hidden = 2, 200, 128, 512

    key = jax.random.PRNGKey(0)
    kx, kw1, kb1, kw2, kb2 = jax.random.split(key, 5)

    x = jax.random.normal(kx, (B, S, d_model), dtype=jnp.float32)

    # Deterministic parameter init (PyTorch nn.Linear-style uniform bounds).
    bound1 = 1.0 / (d_model ** 0.5)
    w1 = jax.random.uniform(kw1, (d_model, hidden), jnp.float32, -bound1, bound1)
    b1 = jax.random.uniform(kb1, (hidden,), jnp.float32, -bound1, bound1)
    bound2 = 1.0 / (hidden ** 0.5)
    w2 = jax.random.uniform(kw2, (hidden, d_model), jnp.float32, -bound2, bound2)
    b2 = jax.random.uniform(kb2, (d_model,), jnp.float32, -bound2, bound2)

    # Plain-JAX reference (highest precision so the check is meaningful).
    hp = jax.lax.Precision.HIGHEST
    ref = jnp.dot(jnp.maximum(jnp.dot(x, w1, precision=hp) + b1, 0.0),
                  w2, precision=hp) + b2

    # f32 path.
    y32 = jax.block_until_ready(positionwise_feed_forward(x, w1, b1, w2, b2))
    assert y32.shape == (B, S, d_model)
    assert jnp.allclose(y32, ref, atol=1e-2, rtol=1e-2), "f32 path mismatch vs reference"

    # bf16 fast path (bf16 inputs/weights, f32 accumulation + f32 bias/ReLU).
    ybf = jax.block_until_ready(
        positionwise_feed_forward(x, w1, b1, w2, b2, compute_dtype=jnp.bfloat16))
    assert ybf.shape == (B, S, d_model)
    assert jnp.allclose(ybf, ref, atol=6e-2, rtol=6e-2), "bf16 path mismatch vs reference"

    print("KERNEL_OK")
</pallas_src>

<mosaic_0001>
module attributes {stable_mosaic.version = 11 : i64} {
  func.func @_ffn_kernel(%arg0: i32, %arg1: i32, %arg2: memref<256x128xf32, #tpu.memory_space<vmem>>, %arg3: memref<128x512xf32, #tpu.memory_space<vmem>>, %arg4: memref<1x512xf32, #tpu.memory_space<vmem>>, %arg5: memref<512x128xf32, #tpu.memory_space<vmem>>, %arg6: memref<1x128xf32, #tpu.memory_space<vmem>>, %arg7: memref<256x128xf32, #tpu.memory_space<vmem>>, %arg8: memref<256x128xf32, #tpu.memory_space<vmem>>) attributes {dimension_semantics = [#tpu.dimension_semantics<parallel>, #tpu.dimension_semantics<arbitrary>], iteration_bounds = array<i64: 2, 1>, scalar_prefetch = 0 : i64, scratch_operands = 1 : i64, tpu.core_type = #tpu.core_type<tc>, window_params = [{transform_indices = @transform_0, window_bounds = array<i64: 256, 128>}, {pipeline_mode = #tpu.pipeline_mode<synchronous>, transform_indices = @transform_1, window_bounds = array<i64: 128, 512>}, {pipeline_mode = #tpu.pipeline_mode<synchronous>, transform_indices = @transform_2, window_bounds = array<i64: 1, 512>}, {pipeline_mode = #tpu.pipeline_mode<synchronous>, transform_indices = @transform_3, window_bounds = array<i64: 512, 128>}, {pipeline_mode = #tpu.pipeline_mode<synchronous>, transform_indices = @transform_4, window_bounds = array<i64: 1, 128>}, {transform_indices = @transform_5, window_bounds = array<i64: 256, 128>}]} {
    %c0_i32 = arith.constant 0 : i32
    %0 = arith.cmpi eq, %arg1, %c0_i32 : i32
    %1 = arith.extui %0 : i1 to i32
    %c0_i32_0 = arith.constant 0 : i32
    %2 = arith.cmpi ne, %1, %c0_i32_0 : i32
    scf.if %2 {
      %cst_16 = arith.constant 0.000000e+00 : f32
      %19 = vector.broadcast %cst_16 : f32 to vector<256x128xf32>
      %c0_17 = arith.constant 0 : index
      %c0_18 = arith.constant 0 : index
      %20 = vector.load %arg8[%c0_17, %c0_18] : memref<256x128xf32, #tpu.memory_space<vmem>>, vector<256x128xf32>
      tpu.vector_store %arg8[%c0_17, %c0_18], %19 {strides = array<i32>} : memref<256x128xf32, #tpu.memory_space<vmem>>, vector<256x128xf32>,
    } else {
    }
    %c0 = arith.constant 0 : index
    %c0_1 = arith.constant 0 : index
    %3 = vector.load %arg2[%c0, %c0_1] : memref<256x128xf32, #tpu.memory_space<vmem>>, vector<256x128xf32>
    %c0_2 = arith.constant 0 : index
    %c0_3 = arith.constant 0 : index
    %4 = vector.load %arg3[%c0_2, %c0_3] : memref<128x512xf32, #tpu.memory_space<vmem>>, vector<128x512xf32>
    %cst = arith.constant dense<0.000000e+00> : vector<256x512xf32>
    %5 = tpu.matmul %3, %4, %cst {dimension_numbers = #tpu.dot_dimension_numbers<[1], [0], [0], [1], [0, 0, 1, 1], [], []>} : vector<256x128xf32>, vector<128x512xf32>, vector<256x512xf32> -> vector<256x512xf32>
    %c0_4 = arith.constant 0 : index
    %c0_5 = arith.constant 0 : index
    %6 = vector.load %arg4[%c0_4, %c0_5] : memref<1x512xf32, #tpu.memory_space<vmem>>, vector<1x512xf32>
    %7 = vector.broadcast %6 : vector<1x512xf32> to vector<256x512xf32>
    %8 = arith.addf %5, %7 : vector<256x512xf32>
    %cst_6 = arith.constant 0.000000e+00 : f32
    %9 = vector.broadcast %cst_6 : f32 to vector<256x512xf32>
    %10 = arith.maximumf %8, %9 : vector<256x512xf32>
    %c0_7 = arith.constant 0 : index
    %c0_8 = arith.constant 0 : index
    %11 = vector.load %arg8[%c0_7, %c0_8] : memref<256x128xf32, #tpu.memory_space<vmem>>, vector<256x128xf32>
    %c0_9 = arith.constant 0 : index
    %c0_10 = arith.constant 0 : index
    %12 = vector.load %arg5[%c0_9, %c0_10] : memref<512x128xf32, #tpu.memory_space<vmem>>, vector<512x128xf32>
    %cst_11 = arith.constant dense<0.000000e+00> : vector<256x128xf32>
    %13 = tpu.matmul %10, %12, %cst_11 {dimension_numbers = #tpu.dot_dimension_numbers<[1], [0], [0], [1], [0, 0, 1, 1], [], []>} : vector<256x512xf32>, vector<512x128xf32>, vector<256x128xf32> -> vector<256x128xf32>
    %14 = arith.addf %11, %13 : vector<256x128xf32>
    %c0_12 = arith.constant 0 : index
    %c0_13 = arith.constant 0 : index
    %15 = vector.load %arg8[%c0_12, %c0_13] : memref<256x128xf32, #tpu.memory_space<vmem>>, vector<256x128xf32>
    tpu.vector_store %arg8[%c0_12, %c0_13], %14 {strides = array<i32>} : memref<256x128xf32, #tpu.memory_space<vmem>>, vector<256x128xf32>,
    %c0_i32_14 = arith.constant 0 : i32
    %16 = arith.cmpi eq, %arg1, %c0_i32_14 : i32
    %17 = arith.extui %16 : i1 to i32
    %c0_i32_15 = arith.constant 0 : i32
    %18 = arith.cmpi ne, %17, %c0_i32_15 : i32
    scf.if %18 {
      %c0_16 = arith.constant 0 : index
      %c0_17 = arith.constant 0 : index
      %19 = vector.load %arg8[%c0_16, %c0_17] : memref<256x128xf32, #tpu.memory_space<vmem>>, vector<256x128xf32>
      %c0_18 = arith.constant 0 : index
      %c0_19 = arith.constant 0 : index
      %20 = vector.load %arg6[%c0_18, %c0_19] : memref<1x128xf32, #tpu.memory_space<vmem>>, vector<1x128xf32>
      %21 = vector.broadcast %20 : vector<1x128xf32> to vector<256x128xf32>
      %22 = arith.addf %19, %21 : vector<256x128xf32>
      %c0_20 = arith.constant 0 : index
      %c0_21 = arith.constant 0 : index
      %23 = vector.load %arg7[%c0_20, %c0_21] : memref<256x128xf32, #tpu.memory_space<vmem>>, vector<256x128xf32>
      tpu.vector_store %arg7[%c0_20, %c0_21], %22 {strides = array<i32>} : memref<256x128xf32, #tpu.memory_space<vmem>>, vector<256x128xf32>,
    } else {
    }
    return
  }
  func.func @transform_0(%arg0: i32, %arg1: i32) -> (i32, i32) {
    %c0_i32 = arith.constant 0 : i32
    %c0_i32_0 = arith.constant 0 : i32
    return %arg0, %c0_i32 : i32, i32
  }
  func.func @transform_1(%arg0: i32, %arg1: i32) -> (i32, i32) {
    %c0_i32 = arith.constant 0 : i32
    %c0_i32_0 = arith.constant 0 : i32
    return %c0_i32, %arg1 : i32, i32
  }
  func.func @transform_2(%arg0: i32, %arg1: i32) -> (i32, i32) {
    %c0_i32 = arith.constant 0 : i32
    %c0_i32_0 = arith.constant 0 : i32
    return %c0_i32, %arg1 : i32, i32
  }
  func.func @transform_3(%arg0: i32, %arg1: i32) -> (i32, i32) {
    %c0_i32 = arith.constant 0 : i32
    %c0_i32_0 = arith.constant 0 : i32
    return %arg1, %c0_i32 : i32, i32
  }
  func.func @transform_4(%arg0: i32, %arg1: i32) -> (i32, i32) {
    %c0_i32 = arith.constant 0 : i32
    %c0_i32_0 = arith.constant 0 : i32
    %c0_i32_1 = arith.constant 0 : i32
    return %c0_i32, %c0_i32_0 : i32, i32
  }
  func.func @transform_5(%arg0: i32, %arg1: i32) -> (i32, i32) {
    %c0_i32 = arith.constant 0 : i32
    %c0_i32_0 = arith.constant 0 : i32
    return %arg0, %c0_i32 : i32, i32
  }
}

</mosaic_0001>

<bundles_post_ra>
// kernel: tpu_custom_call.1
= control target key start
LH: loop header
LB: loop body
LE: loop exit
PB: predicated region body
PF: predicated region fallthrough
CT: control target
= control target key end

     0   :  { %s2910_s0 = inlined_call_operand.hbm [shape: f32[512,128], index: 0, kind: input, shape index: {}]   ;;  %s2911_s1 = inlined_call_operand.hbm [shape: f32[128,512], index: 1, kind: input, shape index: {}]   ;;  %s2912_s2 = inlined_call_operand.hbm [shape: f32[1,512], index: 2, kind: input, shape index: {}]   ;;  %s2913_s3 = inlined_call_operand.hbm [shape: f32[512,128], index: 3, kind: input, shape index: {}]   ;;  %s2914_s4 = inlined_call_operand.vmem [shape: f32[1,128], index: 4, kind: input, shape index: {}]   ;;  %s2915_s5 = inlined_call_operand.hbm [shape: f32[512,128], index: 5, kind: output, shape index: {}]  }
   0x1   :  { %2922 = sst [smem:[#allocation16_spill]] %s2911_s1 }
   0x2   :  { %10 = vsyncpa [#allocation4], 0 }
   0x3   :  { %12 = vsyncpa [#allocation4 + $0x1], 0 }
   0x4   :  { %13 = vsyncpa [#allocation7], 0 }
   0x5   :  { %14 = vsyncpa [#allocation10], 0 }
   0x6   :  { %15 = vsyncpa [#allocation5], 0 }
   0x7   :  { %17 = vsyncpa [#allocation5 + $0x1], 0  ;;  %s2330_s18 = smov 0   ;;  %s2332_s19 = smov 0  }
   0x8   :  { %s2334_s20 = smov 0   ;;  %s2336_s21 = smov 0  }
   0x9   :  { %s2338_s22 = smov 0   ;;  %s2340_s23 = smov 0  }
   0xa LB: > { %s1968_s24 = sadd.s32 4294967295, %s2286_s23   ;;  %s1969_s25 = sadd.s32 4294967294, %s2286_s23   ;;  %s2286_s23 = sphi %s2340_s23, %s23_s23   ;;  %s2282_s22 = sphi %s2338_s22, %s2943_s22   ;;  %s2278_s21 = sphi %s2336_s21, %s2942_s21   ;;  %s2274_s20 = sphi %s2334_s20, %s2941_s20   ;;  %s2270_s19 = sphi %s2332_s19, %s2940_s19   ;;  %s2266_s18 = sphi %s2330_s18, %s2939_s18  }
   0xb   : > { %p55_p0 = scmp.ne.s32.totalorder %s2270_s19, %s2266_s18  ;;  %p2364_p1 = scmp.eq.s32.totalorder %s1968_s24, 0 }
   0xc   : > { %p2368_p2 = scmp.eq.s32.totalorder %s1968_s24, 1  ;;  %p184_p3 = scmp.eq.s32.totalorder %s1969_s25, 1 }
   0xd   : > { %s2923_s26 = scalar_select %p2364_p1, 1, 0 }
   0xe   : > { %p2374_p4 = por %p2364_p1, %p55_p0  ;;  %p1970_p5 = scmp.ge.s32.totalorder %s2286_s23, 1 }
   0xf   : > { %p2379_p6 = por %p184_p3, %p55_p0  ;;  %p191_p7 = scmp.lt.s32.totalorder %s2286_s23, 3 }
  0x10   : > { %s2925_s28 = scalar_select %p2374_p4, 1, 0 }
  0x11   : > { %s2926_s29 = scalar_select %p2379_p6, 1, 0 }
  0x12   : > { %p2384_p8 = pnand %p1970_p5, %p191_p7  ;;  %s2288_s6 = smov [#allocation6]  }
  0x13   : > { %s206_s7 = sshll.u32 %s2288_s6, 4  ;;  %s2289_s9 = smov [#allocation8]   ;;  %s207_s7 = int_to_ptr.vmem [resolvable:$true] %s206_s7 }
  0x14   : > { %s2927_s30 = scalar_select %p2384_p8, 1, 0 }
  0x15   : > { %p2008_p9 = pneg %p2384_p8  ;;  %s223_s10 = sshll.u32 %s2289_s9, 4  ;;  %s224_s10 = int_to_ptr.vmem [resolvable:$true] %s223_s10 }
  0x16   : > { %s2290_s11 = smov [#allocation9]   ;;  %s2103_s13 = scalar_lea.vmem %s207_s7, 8192 }
  0x17   : > { %p2393_p11 = pnand %p2008_p9, %p2364_p1  ;;  %s236_s12 = sshll.u32 %s2290_s11, 4  ;;  %s237_s12 = int_to_ptr.vmem [resolvable:$true] %s236_s12 }
  0x18   : > { %p2104_p13 = scmp.ne.s32.totalorder %s207_s7, %s2103_s13  ;;  %p2111_p5 = scmp.lt.s32.totalorder %s207_s7, %s207_s7 }
  0x19   : > { %p2094_p12 = pneg %p2393_p11  ;;  %p2112_p7 = scmp.lt.s32.totalorder %s2103_s13, %s2103_s13 }
  0x1b   : > { %p2106_p0 = pnand %p2104_p13, %p2094_p12  ;;  %p2113_p9 = por %p2112_p7, %p2111_p5 }
  0x1d   : > { %p2107_p3 = pneg %p2106_p0 }
  0x1f   : > { %p2114_p10 = pnand %p2113_p9, %p2107_p3 }
  0x21   : > { %2117 = shalt.err (!%p2114_p10)
}
  0x22   : > { %s2291_s14 = smov 512   ;;  %s2292_s15 = smov 32  }
  0x23   : > { %s2929_s1 = sld [smem:[#allocation16_spill]]  ;;  %s2129_s24 = scalar_lea.vmem %s224_s10, 64 }
  0x24   : > { %p2130_p6 = scmp.ne.s32.totalorder %s224_s10, %s2129_s24  ;;  %p2137_p1 = scmp.lt.s32.totalorder %s224_s10, %s224_s10 }
  0x25   : > { %p2138_p4 = scmp.lt.s32.totalorder %s2129_s24, %s2129_s24 }
  0x26   : > { %p2132_p13 = pnand %p2130_p6, %p2094_p12 }
  0x27   : > { %p2139_p5 = por %p2138_p4, %p2137_p1 }
  0x28   : > { %p2133_p0 = pneg %p2132_p13 }
  0x29   : > { %2011 = dma.hbm_to_vmem [thread:$0]  (!%p2393_p11), %s2929_s1, 8192, %s207_s7, [#allocation7], %s2291_s14, %s2291_s14, %s2292_s15  }
  0x2a   : > { %p2140_p3 = pnand %p2139_p5, %p2133_p0 }
  0x2c   : > { %2143 = shalt.err (!%p2140_p3)
}
  0x2d   : > { %2014 = dma.hbm_to_vmem [thread:$0]  (!%p2393_p11), %s2912_s2, 64, %s224_s10, [#allocation7]  }
  0x2e   : > { %s2155_s7 = scalar_lea.vmem %s237_s12, 8192  ;;  %p2163_p9 = scmp.lt.s32.totalorder %s237_s12, %s237_s12 }
  0x2f   : > { %p2156_p10 = scmp.ne.s32.totalorder %s237_s12, %s2155_s7  ;;  %p2164_p13 = scmp.lt.s32.totalorder %s2155_s7, %s2155_s7 }
  0x31   : > { %p2158_p7 = pnand %p2156_p10, %p2094_p12  ;;  %p2165_p8 = por %p2164_p13, %p2163_p9 }
  0x33   : > { %p2159_p6 = pneg %p2158_p7 }
  0x35   : > { %p2166_p1 = pnand %p2165_p8, %p2159_p6 }
  0x37   : > { %2169 = shalt.err (!%p2166_p1)
}
  0x38   : > { %s2920_s9 = smov 128   ;;  %s2921_s10 = smov 8  }
  0x39   : > { %2017 = dma.hbm_to_vmem [thread:$0]  (!%p2393_p11), %s2913_s3, 8192, %s237_s12, [#allocation10], %s2920_s9, %s2920_s9, %s2921_s10  }
  0x3a   : > { %s42_s14 = sadd.s32 1, %s2274_s20  ;;  %s35_s15 = sadd.s32 1, %s2282_s22 }
  0x3b   : > { %p49_p4 = scmp.ne.s32.totalorder %s2274_s20, %s2270_s19  ;;  %p37_p8 = scmp.ge.s32.totalorder %s35_s15, 2 }
  0x3c   : > { %p50_p12 = scmp.eq.s32.totalorder %s2286_s23, 0  ;;  %p2029_p5 = scmp.lt.s32.totalorder %s2286_s23, 2 }
  0x3d   : > { %p2433_p0 = por %p2368_p2, %p49_p4  ;;  %s2945_s15 = smov (%p37_p8, %s35_s15), 0 }
  0x3e   : > { %p51_p3 = por %p50_p12, %p49_p4  ;;  %s253_s8 = sand.u32 1, %s2274_s20  }
  0x3f   : > { %s39_s17 = ssub.s32 %s2282_s22, %s2945_s15  ;;  %s1975_s12 = sshll.u32 %s253_s8, 8 }
  0x40   : > { %p40_p10 = scmp.eq.s32.totalorder %s39_s17, 0  ;;  %s1990_s24 = sshll.u32 %s2282_s22, 12 }
  0x41   : > { %s263_s27 = scalar_lea.hbm %s2910_s0, %s1990_s24  ;;  %s257_s11 = scalar_lea.vmem [#allocation3], %s1975_s12 }
  0x42   : > { %s2445_s25 = scalar_select %p40_p10, %s2274_s20, %s42_s14  }
  0x43   : > { %s264_s13 = sshll.u32 %s257_s11, 4  ;;  %p2452_p2 = pnand %p2029_p5, %p51_p3  ;;  %s265_s13 = int_to_ptr.vmem [resolvable:$true] %s264_s13 }
  0x44   : > { %s254_s10 = scalar_lea.sflag [#allocation4], %s253_s8  ;;  %s2183_s17 = scalar_lea.vmem %s265_s13, 4096 }
  0x45   : > { %p2172_p11 = pneg %p2452_p2  ;;  %p2184_p7 = scmp.ne.s32.totalorder %s265_s13, %s2183_s17 }
  0x46   : > { %s2295_s14 = smov [#allocation3]  }
  0x47   : > { %p2186_p6 = pnand %p2184_p7, %p2172_p11  ;;  %s2188_s1 = sshll.u32 %s2295_s14, 4  ;;  %s2189_s1 = int_to_ptr.vmem [resolvable:$false] %s2188_s1 }
  0x48   : > { %s2190_s24 = scalar_lea.vmem %s2189_s1, 8192  ;;  %p2191_p13 = scmp.lt.s32.totalorder %s265_s13, %s2189_s1 }
  0x49   : > { %p2187_p9 = pneg %p2186_p6  ;;  %p2192_p1 = scmp.lt.s32.totalorder %s2190_s24, %s2183_s17 }
  0x4b   : > { %p2193_p4 = por %p2192_p1, %p2191_p13 }
  0x4d   : > { %p2194_p8 = pnand %p2193_p4, %p2187_p9 }
  0x4f   : > { %2197 = shalt.err (!%p2194_p8)
}
  0x50   : > { %s2932_s12 = smov 8   ;;  %s2933_s6 = smov 128  }
  0x51   : > { %2021 = dma.hbm_to_vmem [thread:$0]  (!%p2452_p2), %s263_s27, 4096, %s265_s13, %s254_s10, %s2933_s6, %s2933_s6, %s2932_s12  }
  0x52   : > { %p2934_p12 = scmp.ne.s32.totalorder %s2927_s30, 0 }
  0x53   : > { %s2466_s8 = sand.u32 (!%p2934_p12), 1, %s2270_s19   ;;  %p2935_p5 = scmp.ne.s32.totalorder (!%p2934_p12), %s2925_s28, 0 }
  0x54   : > { %276 = sbr.rel (%p2934_p12) target bundleno = 664 (0x298), region = 40  ;;  %s1979_s1 = sshll.u32 (!%p2934_p12), %s2466_s8, 8 }
  0x55   : > { %s279_s7 = scalar_lea.sflag (!%p2934_p12), [#allocation4], %s2466_s8  ;;  %s2472_s11 = scalar_lea.vmem (!%p2934_p12), [#allocation3], %s1979_s1 }
  0x59   : > { %2249 = dma.done.wait (%p2935_p5), %s279_s7, 4096  }
  0x5a   : > { %2251 = vsyncadd (%p2935_p5), %s279_s7, 4294963200  ;;  %p2936_p3 = scmp.ne.s32.totalorder %s2923_s26, 0 }
  0x5c   : > { %2253 = dma.done.wait (%p2936_p3), [#allocation7], 8256  }
  0x5d   : > { %2255 = vsyncadd (%p2936_p3), [#allocation7], 4294959040 }
  0x5e   : > { %2257 = dma.done.wait (%p2936_p3), [#allocation10], 8192  }
  0x5f   : > { %2259 = vsyncadd (%p2936_p3), [#allocation10], 4294959104  ;;  %v2296_v0 = vmov 0.0   ;;  %v455_v1 = vld [vmem:[#allocation6 + $0x1e8] sm:$0xff]  ;;  %v457_v2 = vld [vmem:[#allocation6 + $0x1f8] sm:$0xff]  ;;  %s2790_s30 = scalar_lea.vmem [#allocation11], %s1979_s1 }
  0x60   : > { %544 = vmatprep.mubr.f32.mxu0 %v2296_v0  ;;  %801 = vmatprep.mubr.f32.mxu1 %v2296_v0  ;;  %v454_v3 = vld [vmem:[#allocation6 + $0x1e0] sm:$0xff]  ;;  %v456_v4 = vld [vmem:[#allocation6 + $0x1f0] sm:$0xff]  ;;  %v451_v5 = vld [vmem:[#allocation6 + $0x1c8] sm:$0xff]  ;;  %s1991_s9 = sshll.u32 %s2278_s21, 12  ;;  %s1852_s10 = sshll.u32 %s2790_s30, 4  ;;  %s2860_s10 = int_to_ptr.vmem [resolvable:$true] %s1852_s10 }
  0x61   : > { %480 = vmatprep.subr.mxu0 %v455_v1  ;;  %737 = vmatprep.subr.mxu1 %v457_v2  ;;  %v453_v6 = vld [vmem:[#allocation6 + $0x1d8] sm:$0xff]  ;;  %v450_v7 = vld [vmem:[#allocation6 + $0x1c0] sm:$0xff]  ;;  %v452_v8 = vld [vmem:[#allocation6 + $0x1d0] sm:$0xff]  ;;  %s2858_s17 = scalar_lea.hbm %s2915_s5, %s1991_s9  ;;  %s1839_s21 = scalar_lea.sflag [#allocation5], %s2466_s8 }
  0x62   : > { %481 = vmatpush1.msra.mxu0 %v454_v3  ;;  %738 = vmatpush1.msra.mxu1 %v456_v4  ;;  %v447_v9 = vld [vmem:[#allocation6 + $0x1a8] sm:$0xff]  ;;  %v449_v10 = vld [vmem:[#allocation6 + $0x1b8] sm:$0xff]  ;;  %v446_v11 = vld [vmem:[#allocation6 + $0x1a0] sm:$0xff]  ;;  %s2198_s14 = scalar_lea.vmem %s2860_s10, 4096  ;;  %s2297_s24 = smov [#allocation11]  }
  0x63   : > { %482 = vmatprep.subr.mxu0 %v451_v5  ;;  %739 = vmatprep.subr.mxu1 %v453_v6  ;;  %v448_v12 = vld [vmem:[#allocation6 + $0x1b0] sm:$0xff]  ;;  %v443_v13 = vld [vmem:[#allocation6 + $0x188] sm:$0xff]  ;;  %v445_v14 = vld [vmem:[#allocation6 + $0x198] sm:$0xff]  ;;  %p2199_p10 = scmp.ne.s32.totalorder %s2860_s10, %s2198_s14  ;;  %s2202_s12 = sshll.u32 %s2297_s24, 4  ;;  %s2203_s12 = int_to_ptr.vmem [resolvable:$false] %s2202_s12 }
  0x64   : > { %483 = vmatpush1.msra.mxu0 %v450_v7  ;;  %740 = vmatpush1.msra.mxu1 %v452_v8  ;;  %v442_v15 = vld [vmem:[#allocation6 + $0x180] sm:$0xff]  ;;  %v444_v16 = vld [vmem:[#allocation6 + $0x190] sm:$0xff]  ;;  %v439_v17 = vld [vmem:[#allocation6 + $0x168] sm:$0xff]  ;;  %s2204_s6 = scalar_lea.vmem %s2203_s12, 8192  ;;  %p2205_p7 = scmp.lt.s32.totalorder %s2860_s10, %s2203_s12 }
  0x65   : > { %484 = vmatprep.subr.mxu0 %v447_v9  ;;  %741 = vmatprep.subr.mxu1 %v449_v10  ;;  %v441_v18 = vld [vmem:[#allocation6 + $0x178] sm:$0xff]  ;;  %v438_v19 = vld [vmem:[#allocation6 + $0x160] sm:$0xff]  ;;  %v440_v20 = vld [vmem:[#allocation6 + $0x170] sm:$0xff]  ;;  %p2200_p2 = pnand %p2199_p10, %p2433_p0  ;;  %p2206_p6 = scmp.lt.s32.totalorder %s2204_s6, %s2198_s14 }
  0x66   : > { %485 = vmatpush1.msra.mxu0 %v446_v11  ;;  %742 = vmatpush1.msra.mxu1 %v448_v12  ;;  %v435_v21 = vld [vmem:[#allocation6 + $0x148] sm:$0xff]  ;;  %v437_v22 = vld [vmem:[#allocation6 + $0x158] sm:$0xff]  ;;  %v434_v23 = vld [vmem:[#allocation6 + $0x140] sm:$0xff] }
  0x67   : > { %486 = vmatprep.subr.mxu0 %v443_v13  ;;  %743 = vmatprep.subr.mxu1 %v445_v14  ;;  %v436_v24 = vld [vmem:[#allocation6 + $0x150] sm:$0xff]  ;;  %v431_v25 = vld [vmem:[#allocation6 + $0x128] sm:$0xff]  ;;  %v433_v26 = vld [vmem:[#allocation6 + $0x138] sm:$0xff]  ;;  %p2201_p11 = pneg %p2200_p2  ;;  %p2207_p9 = por %p2206_p6, %p2205_p7 }
  0x68   : > { %487 = vmatpush1.msra.mxu0 %v442_v15  ;;  %744 = vmatpush1.msra.mxu1 %v444_v16  ;;  %v430_v27 = vld [vmem:[#allocation6 + $0x120] sm:$0xff]  ;;  %v432_v28 = vld [vmem:[#allocation6 + $0x130] sm:$0xff]  ;;  %v427_v29 = vld [vmem:[#allocation6 + $0x108] sm:$0xff] }
  0x69   : > { %488 = vmatprep.subr.mxu0 %v439_v17  ;;  %745 = vmatprep.subr.mxu1 %v441_v18  ;;  %v429_v30 = vld [vmem:[#allocation6 + $0x118] sm:$0xff]  ;;  %v426_v31 = vld [vmem:[#allocation6 + $0x100] sm:$0xff]  ;;  %v428_v32 = vld [vmem:[#allocation6 + $0x110] sm:$0xff]  ;;  %p2208_p13 = pnand %p2207_p9, %p2201_p11 }
  0x6a   : > { %489 = vmatpush1.msra.mxu0 %v438_v19  ;;  %746 = vmatpush1.msra.mxu1 %v440_v20  ;;  %v423_v33 = vld [vmem:[#allocation6 + $0xe8] sm:$0xff]  ;;  %v425_v34 = vld [vmem:[#allocation6 + $0xf8] sm:$0xff]  ;;  %v422_v35 = vld [vmem:[#allocation6 + $0xe0] sm:$0xff] }
  0x6b   : > { %490 = vmatprep.subr.mxu0 %v435_v21  ;;  %747 = vmatprep.subr.mxu1 %v437_v22  ;;  %v424_v36 = vld [vmem:[#allocation6 + $0xf0] sm:$0xff]  ;;  %v419_v37 = vld [vmem:[#allocation6 + $0xc8] sm:$0xff]  ;;  %v421_v38 = vld [vmem:[#allocation6 + $0xd8] sm:$0xff] }
  0x6c   : > { %491 = vmatpush1.msra.mxu0 %v434_v23  ;;  %748 = vmatpush1.msra.mxu1 %v436_v24  ;;  %v418_v39 = vld [vmem:[#allocation6 + $0xc0] sm:$0xff]  ;;  %v420_v40 = vld [vmem:[#allocation6 + $0xd0] sm:$0xff]  ;;  %v415_v41 = vld [vmem:[#allocation6 + $0xa8] sm:$0xff] }
  0x6d   : > { %492 = vmatprep.subr.mxu0 %v431_v25  ;;  %749 = vmatprep.subr.mxu1 %v433_v26  ;;  %v417_v42 = vld [vmem:[#allocation6 + $0xb8] sm:$0xff]  ;;  %v414_v43 = vld [vmem:[#allocation6 + $0xa0] sm:$0xff]  ;;  %v416_v44 = vld [vmem:[#allocation6 + $0xb0] sm:$0xff] }
  0x6e   : > { %493 = vmatpush1.msra.mxu0 %v430_v27  ;;  %750 = vmatpush1.msra.mxu1 %v432_v28  ;;  %v411_v45 = vld [vmem:[#allocation6 + $0x88] sm:$0xff]  ;;  %v413_v46 = vld [vmem:[#allocation6 + $0x98] sm:$0xff]  ;;  %v410_v47 = vld [vmem:[#allocation6 + $0x80] sm:$0xff] }
  0x6f   : > { %494 = vmatprep.subr.mxu0 %v427_v29  ;;  %751 = vmatprep.subr.mxu1 %v429_v30  ;;  %v412_v48 = vld [vmem:[#allocation6 + $0x90] sm:$0xff]  ;;  %v407_v49 = vld [vmem:[#allocation6 + $0x68] sm:$0xff]  ;;  %v409_v50 = vld [vmem:[#allocation6 + $0x78] sm:$0xff] }
  0x70   : > { %495 = vmatpush1.msra.mxu0 %v426_v31  ;;  %752 = vmatpush1.msra.mxu1 %v428_v32  ;;  %v406_v51 = vld [vmem:[#allocation6 + $0x60] sm:$0xff]  ;;  %v408_v52 = vld [vmem:[#allocation6 + $0x70] sm:$0xff]  ;;  %v403_v53 = vld [vmem:[#allocation6 + $0x48] sm:$0xff] }
  0x71   : > { %496 = vmatprep.subr.mxu0 %v423_v33  ;;  %753 = vmatprep.subr.mxu1 %v425_v34  ;;  %v405_v54 = vld [vmem:[#allocation6 + $0x58] sm:$0xff]  ;;  %v402_v55 = vld [vmem:[#allocation6 + $0x40] sm:$0xff]  ;;  %v404_v56 = vld [vmem:[#allocation6 + $0x50] sm:$0xff] }
  0x72   : > { %497 = vmatpush1.msra.mxu0 %v422_v35  ;;  %754 = vmatpush1.msra.mxu1 %v424_v36  ;;  %v399_v57 = vld [vmem:[#allocation6 + $0x28] sm:$0xff]  ;;  %v401_v58 = vld [vmem:[#allocation6 + $0x38] sm:$0xff]  ;;  %v398_v59 = vld [vmem:[#allocation6 + $0x20] sm:$0xff] }
  0x73   : > { %498 = vmatprep.subr.mxu0 %v419_v37  ;;  %755 = vmatprep.subr.mxu1 %v421_v38  ;;  %v400_v60 = vld [vmem:[#allocation6 + $0x30] sm:$0xff]  ;;  %v395_v61 = vld [vmem:[#allocation6 + $0x8] sm:$0xff]  ;;  %v397_v62 = vld [vmem:[#allocation6 + $0x18] sm:$0xff] }
  0x74   : > { %499 = vmatpush1.msra.mxu0 %v418_v39  ;;  %756 = vmatpush1.msra.mxu1 %v420_v40  ;;  %v394_v63 = vld [vmem:[#allocation6] sm:$0xff]  ;;  %v396_v1 = vld [vmem:[#allocation6 + $0x10] sm:$0xff]  ;;  %v363_v5 = vld [vmem:[%s2472_s11 + $0x8] sm:$0xff] }
  0x75   : > { %500 = vmatprep.subr.mxu0 %v415_v41  ;;  %757 = vmatprep.subr.mxu1 %v417_v42  ;;  %v362_v2 = vld [vmem:[%s2472_s11] sm:$0xff]  ;;  %v1168_v6 = vld [vmem:[#allocation9 + $0x70] sm:$0xff]  ;;  %v1167_v9 = vld [vmem:[#allocation9 + $0x68] sm:$0xff] }
  0x76   : > { %501 = vmatpush1.msra.mxu0 %v414_v43  ;;  %758 = vmatpush1.msra.mxu1 %v416_v44  ;;  %v1169_v3 = vld [vmem:[#allocation9 + $0x78] sm:$0xff]  ;;  %v1200_v7 = vld [vmem:[#allocation9 + $0x170] sm:$0xff]  ;;  %v1199_v10 = vld [vmem:[#allocation9 + $0x168] sm:$0xff] }
  0x77   : > { %502 = vmatprep.subr.mxu0 %v411_v45  ;;  %759 = vmatprep.subr.mxu1 %v413_v46  ;;  %v1201_v4 = vld [vmem:[#allocation9 + $0x178] sm:$0xff]  ;;  %v364_v8 = vld [vmem:[%s2472_s11 + $0x10] sm:$0xff]  ;;  %v1166_v12 = vld [vmem:[#allocation9 + $0x60] sm:$0xff] }
  0x78   : > { %503 = vmatpush1.msra.mxu0 %v410_v47  ;;  %760 = vmatpush1.msra.mxu1 %v412_v48  ;;  %v365_v11 = vld [vmem:[%s2472_s11 + $0x18] sm:$0xff]  ;;  %v1198_v13 = vld [vmem:[#allocation9 + $0x160] sm:$0xff]  ;;  %v368_v20 = vld [vmem:[%s2472_s11 + $0x30] sm:$0xff] }
  0x79   : > { %504 = vmatprep.subr.mxu0 %v407_v49  ;;  %761 = vmatprep.subr.mxu1 %v409_v50  ;;  %v366_v14 = vld [vmem:[%s2472_s11 + $0x20] sm:$0xff]  ;;  %v367_v17 = vld [vmem:[%s2472_s11 + $0x28] sm:$0xff]  ;;  %v1164_v18 = vld [vmem:[#allocation9 + $0x50] sm:$0xff] }
  0x7a   : > { %505 = vmatpush1.msra.mxu0 %v406_v51  ;;  %762 = vmatpush1.msra.mxu1 %v408_v52  ;;  %v1165_v15 = vld [vmem:[#allocation9 + $0x58] sm:$0xff]  ;;  %v1196_v19 = vld [vmem:[#allocation9 + $0x150] sm:$0xff]  ;;  %v1163_v21 = vld [vmem:[#allocation9 + $0x48] sm:$0xff] }
  0x7b   : > { %506 = vmatprep.subr.mxu0 %v403_v53  ;;  %763 = vmatprep.subr.mxu1 %v405_v54  ;;  %v1197_v16 = vld [vmem:[#allocation9 + $0x158] sm:$0xff]  ;;  %v1195_v22 = vld [vmem:[#allocation9 + $0x148] sm:$0xff]  ;;  %v1162_v24 = vld [vmem:[#allocation9 + $0x40] sm:$0xff] }
  0x7c   : > { %507 = vmatpush1.msra.mxu0 %v402_v55  ;;  %764 = vmatpush1.msra.mxu1 %v404_v56  ;;  %v369_v23 = vld [vmem:[%s2472_s11 + $0x38] sm:$0xff]  ;;  %v1194_v25 = vld [vmem:[#allocation9 + $0x140] sm:$0xff]  ;;  %v372_v32 = vld [vmem:[%s2472_s11 + $0x50] sm:$0xff] }
  0x7d   : > { %508 = vmatprep.subr.mxu0 %v399_v57  ;;  %765 = vmatprep.subr.mxu1 %v401_v58  ;;  %v370_v26 = vld [vmem:[%s2472_s11 + $0x40] sm:$0xff]  ;;  %v371_v29 = vld [vmem:[%s2472_s11 + $0x48] sm:$0xff]  ;;  %v1160_v30 = vld [vmem:[#allocation9 + $0x30] sm:$0xff] }
  0x7e   : > { %509 = vmatpush1.msra.mxu0 %v398_v59  ;;  %766 = vmatpush1.msra.mxu1 %v400_v60  ;;  %v1161_v27 = vld [vmem:[#allocation9 + $0x38] sm:$0xff]  ;;  %v1192_v31 = vld [vmem:[#allocation9 + $0x130] sm:$0xff]  ;;  %v1159_v33 = vld [vmem:[#allocation9 + $0x28] sm:$0xff] }
  0x7f   : > { %510 = vmatprep.subr.mxu0 %v395_v61  ;;  %767 = vmatprep.subr.mxu1 %v397_v62  ;;  %v1193_v28 = vld [vmem:[#allocation9 + $0x138] sm:$0xff]  ;;  %v1191_v34 = vld [vmem:[#allocation9 + $0x128] sm:$0xff]  ;;  %v1158_v36 = vld [vmem:[#allocation9 + $0x20] sm:$0xff] }
  0x80   : > { %511 = vmatpush1.msra.mxu0 %v394_v63  ;;  %768 = vmatpush1.msra.mxu1 %v396_v1  ;;  %v373_v35 = vld [vmem:[%s2472_s11 + $0x58] sm:$0xff]  ;;  %v1190_v37 = vld [vmem:[#allocation9 + $0x120] sm:$0xff]  ;;  %v376_v44 = vld [vmem:[%s2472_s11 + $0x70] sm:$0xff] }
  0x81   : > { %545 = vmatmul.mubr.f32.vlgmr.msra.gmra.mxu0 %v362_v2  ;;  %802 = vmatmul.mubr.f32.vlgmr.msra.gmra.mxu1 %v362_v2  ;;  %v374_v38 = vld [vmem:[%s2472_s11 + $0x60] sm:$0xff]  ;;  %v375_v41 = vld [vmem:[%s2472_s11 + $0x68] sm:$0xff]  ;;  %v1156_v42 = vld [vmem:[#allocation9 + $0x10] sm:$0xff] }
  0x82   : > { %550 = vmatprep.mubr.f32.mxu0 %v2296_v0  ;;  %807 = vmatprep.mubr.f32.mxu1 %v2296_v0  ;;  %v1157_v39 = vld [vmem:[#allocation9 + $0x18] sm:$0xff]  ;;  %v1188_v43 = vld [vmem:[#allocation9 + $0x110] sm:$0xff]  ;;  %v1155_v45 = vld [vmem:[#allocation9 + $0x8] sm:$0xff] }
  0x83   : > { %1218 = vmatprep.subr.mxu0 %v2296_v0  ;;  %1443 = vmatprep.subr.mxu1 %v2296_v0  ;;  %v1189_v40 = vld [vmem:[#allocation9 + $0x118] sm:$0xff]  ;;  %v1187_v46 = vld [vmem:[#allocation9 + $0x108] sm:$0xff]  ;;  %v1154_v48 = vld [vmem:[#allocation9] sm:$0xff] }
  0x84   : > { %1219 = vmatpush1.msra.mxu0 %v1169_v3  ;;  %1444 = vmatpush1.msra.mxu1 %v1201_v4  ;;  %v377_v47 = vld [vmem:[%s2472_s11 + $0x78] sm:$0xff]  ;;  %v1186_v49 = vld [vmem:[#allocation9 + $0x100] sm:$0xff]  ;;  %v380_v56 = vld [vmem:[%s2472_s11 + $0x90] sm:$0xff] }
  0x85   : > { %551 = vmatmul.mubr.f32.gmra.mxu0 %v363_v5  ;;  %808 = vmatmul.mubr.f32.gmra.mxu1 %v363_v5  ;;  %v378_v50 = vld [vmem:[%s2472_s11 + $0x80] sm:$0xff]  ;;  %v379_v53 = vld [vmem:[%s2472_s11 + $0x88] sm:$0xff]  ;;  %v1184_v54 = vld [vmem:[#allocation9 + $0xf0] sm:$0xff] }
  0x86   : > { %556 = vmatprep.mubr.f32.mxu0 %v2296_v0  ;;  %813 = vmatprep.mubr.f32.mxu1 %v2296_v0  ;;  %v1185_v51 = vld [vmem:[#allocation9 + $0xf8] sm:$0xff]  ;;  %v1216_v55 = vld [vmem:[#allocation9 + $0x1f0] sm:$0xff]  ;;  %v1183_v57 = vld [vmem:[#allocation9 + $0xe8] sm:$0xff] }
  0x87   : > { %1220 = vmatprep.subr.mxu0 %v2296_v0  ;;  %1445 = vmatprep.subr.mxu1 %v2296_v0  ;;  %v1217_v52 = vld [vmem:[#allocation9 + $0x1f8] sm:$0xff]  ;;  %v1215_v58 = vld [vmem:[#allocation9 + $0x1e8] sm:$0xff]  ;;  %v1182_v60 = vld [vmem:[#allocation9 + $0xe0] sm:$0xff] }
  0x88   : > { %1221 = vmatpush1.msra.mxu0 %v1168_v6  ;;  %1446 = vmatpush1.msra.mxu1 %v1200_v7  ;;  %v381_v59 = vld [vmem:[%s2472_s11 + $0x98] sm:$0xff]  ;;  %v1214_v61 = vld [vmem:[#allocation9 + $0x1e0] sm:$0xff]  ;;  %v384_v5 = vld [vmem:[%s2472_s11 + $0xb0] sm:$0xff] }
  0x89   : > { %557 = vmatmul.mubr.f32.gmra.mxu0 %v364_v8  ;;  %814 = vmatmul.mubr.f32.gmra.mxu1 %v364_v8  ;;  %v382_v62 = vld [vmem:[%s2472_s11 + $0xa0] sm:$0xff]  ;;  %v383_v2 = vld [vmem:[%s2472_s11 + $0xa8] sm:$0xff]  ;;  %v1180_v3 = vld [vmem:[#allocation9 + $0xd0] sm:$0xff] }
  0x8a   : > { %562 = vmatprep.mubr.f32.mxu0 %v2296_v0  ;;  %819 = vmatprep.mubr.f32.mxu1 %v2296_v0  ;;  %v1181_v63 = vld [vmem:[#allocation9 + $0xd8] sm:$0xff]  ;;  %v1212_v4 = vld [vmem:[#allocation9 + $0x1d0] sm:$0xff]  ;;  %v1179_v6 = vld [vmem:[#allocation9 + $0xc8] sm:$0xff] }
  0x8b   : > { %1222 = vmatprep.subr.mxu0 %v2296_v0  ;;  %1447 = vmatprep.subr.mxu1 %v2296_v0  ;;  %v1213_v1 = vld [vmem:[#allocation9 + $0x1d8] sm:$0xff]  ;;  %v1211_v7 = vld [vmem:[#allocation9 + $0x1c8] sm:$0xff] }
  0x8c   : > { %1223 = vmatpush1.msra.mxu0 %v1167_v9  ;;  %1448 = vmatpush1.msra.mxu1 %v1199_v10  ;;  %v385_v8 = vld [vmem:[%s2472_s11 + $0xb8] sm:$0xff]  ;;  %v1178_v9 = vld [vmem:[#allocation9 + $0xc0] sm:$0xff] }
  0x8d   : > { %563 = vmatmul.mubr.f32.gmra.mxu0 %v365_v11  ;;  %820 = vmatmul.mubr.f32.gmra.mxu1 %v365_v11  ;;  %v1210_v10 = vld [vmem:[#allocation9 + $0x1c0] sm:$0xff] }
  0x8e   : > { %568 = vmatprep.mubr.f32.mxu0 %v2296_v0  ;;  %825 = vmatprep.mubr.f32.mxu1 %v2296_v0  ;;  %v386_v11 = vld [vmem:[%s2472_s11 + $0xc0] sm:$0xff] }
  0x8f   : > { %1224 = vmatprep.subr.mxu0 %v2296_v0  ;;  %1449 = vmatprep.subr.mxu1 %v2296_v0 }
  0x90   : > { %1225 = vmatpush1.msra.mxu0 %v1166_v12  ;;  %1450 = vmatpush1.msra.mxu1 %v1198_v13  ;;  %v1177_v12 = vld [vmem:[#allocation9 + $0xb8] sm:$0xff] }
  0x91   : > { %569 = vmatmul.mubr.f32.gmra.mxu0 %v366_v14  ;;  %826 = vmatmul.mubr.f32.gmra.mxu1 %v366_v14  ;;  %v1209_v13 = vld [vmem:[#allocation9 + $0x1b8] sm:$0xff]  ;;  %v387_v14 = vld [vmem:[%s2472_s11 + $0xc8] sm:$0xff] }
  0x92   : > { %574 = vmatprep.mubr.f32.mxu0 %v2296_v0  ;;  %831 = vmatprep.mubr.f32.mxu1 %v2296_v0 }
  0x93   : > { %1226 = vmatprep.subr.mxu0 %v2296_v0  ;;  %1451 = vmatprep.subr.mxu1 %v2296_v0 }
  0x94   : > { %1227 = vmatpush1.msra.mxu0 %v1165_v15  ;;  %1452 = vmatpush1.msra.mxu1 %v1197_v16  ;;  %v1176_v15 = vld [vmem:[#allocation9 + $0xb0] sm:$0xff] }
  0x95   : > { %575 = vmatmul.mubr.f32.gmra.mxu0 %v367_v17  ;;  %832 = vmatmul.mubr.f32.gmra.mxu1 %v367_v17  ;;  %v1208_v16 = vld [vmem:[#allocation9 + $0x1b0] sm:$0xff] }
  0x96   : > { %580 = vmatprep.mubr.f32.mxu0 %v2296_v0  ;;  %837 = vmatprep.mubr.f32.mxu1 %v2296_v0  ;;  %v388_v17 = vld [vmem:[%s2472_s11 + $0xd0] sm:$0xff] }
  0x97   : > { %1228 = vmatprep.subr.mxu0 %v2296_v0  ;;  %1453 = vmatprep.subr.mxu1 %v2296_v0 }
  0x98   : > { %1229 = vmatpush1.msra.mxu0 %v1164_v18  ;;  %1454 = vmatpush1.msra.mxu1 %v1196_v19  ;;  %v1175_v18 = vld [vmem:[#allocation9 + $0xa8] sm:$0xff] }
  0x99   : > { %581 = vmatmul.mubr.f32.gmra.mxu0 %v368_v20  ;;  %838 = vmatmul.mubr.f32.gmra.mxu1 %v368_v20  ;;  %v1207_v19 = vld [vmem:[#allocation9 + $0x1a8] sm:$0xff]  ;;  %v389_v20 = vld [vmem:[%s2472_s11 + $0xd8] sm:$0xff] }
  0x9a   : > { %586 = vmatprep.mubr.f32.mxu0 %v2296_v0  ;;  %843 = vmatprep.mubr.f32.mxu1 %v2296_v0 }
  0x9b   : > { %1230 = vmatprep.subr.mxu0 %v2296_v0  ;;  %1455 = vmatprep.subr.mxu1 %v2296_v0 }
  0x9c   : > { %1231 = vmatpush1.msra.mxu0 %v1163_v21  ;;  %1456 = vmatpush1.msra.mxu1 %v1195_v22  ;;  %v1174_v21 = vld [vmem:[#allocation9 + $0xa0] sm:$0xff] }
  0x9d   : > { %587 = vmatmul.mubr.f32.gmra.mxu0 %v369_v23  ;;  %844 = vmatmul.mubr.f32.gmra.mxu1 %v369_v23  ;;  %v1206_v22 = vld [vmem:[#allocation9 + $0x1a0] sm:$0xff] }
  0x9e   : > { %592 = vmatprep.mubr.f32.mxu0 %v2296_v0  ;;  %849 = vmatprep.mubr.f32.mxu1 %v2296_v0  ;;  %v390_v23 = vld [vmem:[%s2472_s11 + $0xe0] sm:$0xff] }
  0x9f   : > { %1232 = vmatprep.subr.mxu0 %v2296_v0  ;;  %1457 = vmatprep.subr.mxu1 %v2296_v0 }
  0xa0   : > { %1233 = vmatpush1.msra.mxu0 %v1162_v24  ;;  %1458 = vmatpush1.msra.mxu1 %v1194_v25  ;;  %v1173_v24 = vld [vmem:[#allocation9 + $0x98] sm:$0xff] }
  0xa1   : > { %593 = vmatmul.mubr.f32.gmra.mxu0 %v370_v26  ;;  %850 = vmatmul.mubr.f32.gmra.mxu1 %v370_v26  ;;  %v1205_v25 = vld [vmem:[#allocation9 + $0x198] sm:$0xff]  ;;  %v391_v26 = vld [vmem:[%s2472_s11 + $0xe8] sm:$0xff] }
  0xa2   : > { %598 = vmatprep.mubr.f32.mxu0 %v2296_v0  ;;  %855 = vmatprep.mubr.f32.mxu1 %v2296_v0 }
  0xa3   : > { %1234 = vmatprep.subr.mxu0 %v2296_v0  ;;  %1459 = vmatprep.subr.mxu1 %v2296_v0 }
  0xa4   : > { %1235 = vmatpush1.msra.mxu0 %v1161_v27  ;;  %1460 = vmatpush1.msra.mxu1 %v1193_v28  ;;  %v1172_v27 = vld [vmem:[#allocation9 + $0x90] sm:$0xff] }
  0xa5   : > { %599 = vmatmul.mubr.f32.gmra.mxu0 %v371_v29  ;;  %856 = vmatmul.mubr.f32.gmra.mxu1 %v371_v29  ;;  %v1204_v28 = vld [vmem:[#allocation9 + $0x190] sm:$0xff] }
  0xa6   : > { %604 = vmatprep.mubr.f32.mxu0 %v2296_v0  ;;  %861 = vmatprep.mubr.f32.mxu1 %v2296_v0  ;;  %v392_v29 = vld [vmem:[%s2472_s11 + $0xf0] sm:$0xff] }
  0xa7   : > { %1236 = vmatprep.subr.mxu0 %v2296_v0  ;;  %1461 = vmatprep.subr.mxu1 %v2296_v0 }
  0xa8   : > { %1237 = vmatpush1.msra.mxu0 %v1160_v30  ;;  %1462 = vmatpush1.msra.mxu1 %v1192_v31  ;;  %v1171_v30 = vld [vmem:[#allocation9 + $0x88] sm:$0xff] }
  0xa9   : > { %605 = vmatmul.mubr.f32.gmra.mxu0 %v372_v32  ;;  %862 = vmatmul.mubr.f32.gmra.mxu1 %v372_v32  ;;  %v1203_v31 = vld [vmem:[#allocation9 + $0x188] sm:$0xff]  ;;  %v393_v32 = vld [vmem:[%s2472_s11 + $0xf8] sm:$0xff] }
  0xaa   : > { %610 = vmatprep.mubr.f32.mxu0 %v2296_v0  ;;  %867 = vmatprep.mubr.f32.mxu1 %v2296_v0 }
  0xab   : > { %1238 = vmatprep.subr.mxu0 %v2296_v0  ;;  %1463 = vmatprep.subr.mxu1 %v2296_v0 }
  0xac   : > { %1239 = vmatpush1.msra.mxu0 %v1159_v33  ;;  %1464 = vmatpush1.msra.mxu1 %v1191_v34  ;;  %v1170_v33 = vld [vmem:[#allocation9 + $0x80] sm:$0xff] }
  0xad   : > { %611 = vmatmul.mubr.f32.gmra.mxu0 %v373_v35  ;;  %868 = vmatmul.mubr.f32.gmra.mxu1 %v373_v35  ;;  %v1202_v34 = vld [vmem:[#allocation9 + $0x180] sm:$0xff]  ;;  %v460_v35 = vlaneseq }
  0xae   : > { %616 = vmatprep.mubr.f32.mxu0 %v2296_v0  ;;  %873 = vmatprep.mubr.f32.mxu1 %v2296_v0 }
  0xaf   : > { %1240 = vmatprep.subr.mxu0 %v2296_v0  ;;  %1465 = vmatprep.subr.mxu1 %v2296_v0 }
  0xb0   : > { %1241 = vmatpush1.msra.mxu0 %v1158_v36  ;;  %1466 = vmatpush1.msra.mxu1 %v1190_v37  ;;  %v461_v36 = vshrl.u32 %v460_v35, 7 }
  0xb1   : > { %617 = vmatmul.mubr.f32.gmra.mxu0 %v374_v38  ;;  %874 = vmatmul.mubr.f32.gmra.mxu1 %v374_v38 }
  0xb2   : > { %622 = vmatprep.mubr.f32.mxu0 %v2296_v0  ;;  %879 = vmatprep.mubr.f32.mxu1 %v2296_v0  ;;  %v462_v37 = vsub.s32 0, %v461_v36  ;;  %v470_v38 = vsub.s32 2, %v461_v36 }
  0xb3   : > { %1242 = vmatprep.subr.mxu0 %v2296_v0  ;;  %1467 = vmatprep.subr.mxu1 %v2296_v0 }
  0xb4   : > { %1243 = vmatpush1.msra.mxu0 %v1157_v39  ;;  %1468 = vmatpush1.msra.mxu1 %v1189_v40  ;;  %v458_v39 = vld [vmem:[#allocation8] sm:$0xf]  ;;  %v466_v40 = vsub.s32 1, %v461_v36 }
  0xb5   : > { %623 = vmatmul.mubr.f32.gmra.mxu0 %v375_v41  ;;  %880 = vmatmul.mubr.f32.gmra.mxu1 %v375_v41  ;;  %v474_v41 = vsub.s32 3, %v461_v36 }
  0xb6   : > { %628 = vmatprep.mubr.f32.mxu0 %v2296_v0  ;;  %885 = vmatprep.mubr.f32.mxu1 %v2296_v0 }
  0xb7   : > { %1244 = vmatprep.subr.mxu0 %v2296_v0  ;;  %1469 = vmatprep.subr.mxu1 %v2296_v0 }
  0xb8   : > { %1245 = vmatpush1.msra.mxu0 %v1156_v42  ;;  %1470 = vmatpush1.msra.mxu1 %v1188_v43  ;;  %v2646_v42 = vrot.slane %v458_v39, %v462_v37  ;;  %v2648_v43 = vrot.slane %v458_v39, %v470_v38 }
  0xb9   : > { %629 = vmatmul.mubr.f32.gmra.mxu0 %v376_v44  ;;  %886 = vmatmul.mubr.f32.gmra.mxu1 %v376_v44  ;;  %v2650_v44 = vrot.slane %v458_v39, %v466_v40 }
  0xba   : > { %634 = vmatprep.mubr.f32.mxu0 %v2296_v0  ;;  %891 = vmatprep.mubr.f32.mxu1 %v2296_v0 }
  0xbb   : > { %1246 = vmatprep.subr.mxu0 %v2296_v0  ;;  %1471 = vmatprep.subr.mxu1 %v2296_v0 }
  0xbc   : > { %1247 = vmatpush1.msra.mxu0 %v1155_v45  ;;  %1472 = vmatpush1.msra.mxu1 %v1187_v46  ;;  %v2652_v45 = vrot.slane %v458_v39, %v474_v41 }
  0xbd   : > { %635 = vmatmul.mubr.f32.gmra.mxu0 %v377_v47  ;;  %892 = vmatmul.mubr.f32.gmra.mxu1 %v377_v47 }
  0xbe   : > { %640 = vmatprep.mubr.f32.mxu0 %v2296_v0  ;;  %897 = vmatprep.mubr.f32.mxu1 %v2296_v0 }
  0xbf   : > { %1248 = vmatprep.subr.mxu0 %v2296_v0  ;;  %1473 = vmatprep.subr.mxu1 %v2296_v0 }
  0xc0   : > { %1249 = vmatpush1.msra.mxu0 %v1154_v48  ;;  %1474 = vmatpush1.msra.mxu1 %v1186_v49 }
  0xc1   : > { %641 = vmatmul.mubr.f32.gmra.mxu0 %v378_v50  ;;  %898 = vmatmul.mubr.f32.gmra.mxu1 %v378_v50 }
  0xc2   : > { %646 = vmatprep.mubr.f32.mxu0 %v2296_v0  ;;  %903 = vmatprep.mubr.f32.mxu1 %v2296_v0 }
  0xc3   : > { %1250 = vmatprep.subr.mxu0 %v2296_v0  ;;  %1475 = vmatprep.subr.mxu1 %v2296_v0 }
  0xc4   : > { %1251 = vmatpush2.msra.mxu0 %v1185_v51  ;;  %1476 = vmatpush2.msra.mxu1 %v1217_v52 }
  0xc5   : > { %647 = vmatmul.mubr.f32.gmra.mxu0 %v379_v53  ;;  %904 = vmatmul.mubr.f32.gmra.mxu1 %v379_v53 }
  0xc6   : > { %652 = vmatprep.mubr.f32.mxu0 %v2296_v0  ;;  %909 = vmatprep.mubr.f32.mxu1 %v2296_v0 }
  0xc7   : > { %1252 = vmatprep.subr.mxu0 %v2296_v0  ;;  %1477 = vmatprep.subr.mxu1 %v2296_v0 }
  0xc8   : > { %1253 = vmatpush2.msra.mxu0 %v1184_v54  ;;  %1478 = vmatpush2.msra.mxu1 %v1216_v55 }
  0xc9   : > { %653 = vmatmul.mubr.f32.gmra.mxu0 %v380_v56  ;;  %910 = vmatmul.mubr.f32.gmra.mxu1 %v380_v56 }
  0xca   : > { %658 = vmatprep.mubr.f32.mxu0 %v2296_v0  ;;  %915 = vmatprep.mubr.f32.mxu1 %v2296_v0 }
  0xcb   : > { %1254 = vmatprep.subr.mxu0 %v2296_v0  ;;  %1479 = vmatprep.subr.mxu1 %v2296_v0 }
  0xcc   : > { %1255 = vmatpush2.msra.mxu0 %v1183_v57  ;;  %1480 = vmatpush2.msra.mxu1 %v1215_v58 }
  0xcd   : > { %659 = vmatmul.mubr.f32.gmra.mxu0 %v381_v59  ;;  %916 = vmatmul.mubr.f32.gmra.mxu1 %v381_v59 }
  0xce   : > { %664 = vmatprep.mubr.f32.mxu0 %v2296_v0  ;;  %921 = vmatprep.mubr.f32.mxu1 %v2296_v0 }
  0xcf   : > { %1256 = vmatprep.subr.mxu0 %v2296_v0  ;;  %1481 = vmatprep.subr.mxu1 %v2296_v0 }
  0xd0   : > { %1257 = vmatpush2.msra.mxu0 %v1182_v60  ;;  %1482 = vmatpush2.msra.mxu1 %v1214_v61 }
  0xd1   : > { %665 = vmatmul.mubr.f32.gmra.mxu0 %v382_v62  ;;  %922 = vmatmul.mubr.f32.gmra.mxu1 %v382_v62 }
  0xd2   : > { %670 = vmatprep.mubr.f32.mxu0 %v2296_v0  ;;  %927 = vmatprep.mubr.f32.mxu1 %v2296_v0 }
  0xd3   : > { %1258 = vmatprep.subr.mxu0 %v2296_v0  ;;  %1483 = vmatprep.subr.mxu1 %v2296_v0 }
  0xd4   : > { %1259 = vmatpush2.msra.mxu0 %v1181_v63  ;;  %1484 = vmatpush2.msra.mxu1 %v1213_v1 }
  0xd5   : > { %671 = vmatmul.mubr.f32.gmra.mxu0 %v383_v2  ;;  %928 = vmatmul.mubr.f32.gmra.mxu1 %v383_v2 }
  0xd6   : > { %676 = vmatprep.mubr.f32.mxu0 %v2296_v0  ;;  %933 = vmatprep.mubr.f32.mxu1 %v2296_v0 }
  0xd7   : > { %1260 = vmatprep.subr.mxu0 %v2296_v0  ;;  %1485 = vmatprep.subr.mxu1 %v2296_v0 }
  0xd8   : > { %1261 = vmatpush2.msra.mxu0 %v1180_v3  ;;  %1486 = vmatpush2.msra.mxu1 %v1212_v4 }
  0xd9   : > { %677 = vmatmul.mubr.f32.gmra.mxu0 %v384_v5  ;;  %934 = vmatmul.mubr.f32.gmra.mxu1 %v384_v5 }
  0xda   : > { %682 = vmatprep.mubr.f32.mxu0 %v2296_v0  ;;  %939 = vmatprep.mubr.f32.mxu1 %v2296_v0 }
  0xdb   : > { %1262 = vmatprep.subr.mxu0 %v2296_v0  ;;  %1487 = vmatprep.subr.mxu1 %v2296_v0 }
  0xdc   : > { %1263 = vmatpush2.msra.mxu0 %v1179_v6  ;;  %1488 = vmatpush2.msra.mxu1 %v1211_v7 }
  0xdd   : > { %683 = vmatmul.mubr.f32.gmra.mxu0 %v385_v8  ;;  %940 = vmatmul.mubr.f32.gmra.mxu1 %v385_v8 }
  0xde   : > { %688 = vmatprep.mubr.f32.mxu0 %v2296_v0  ;;  %945 = vmatprep.mubr.f32.mxu1 %v2296_v0 }
  0xdf   : > { %1264 = vmatprep.subr.mxu0 %v2296_v0  ;;  %1489 = vmatprep.subr.mxu1 %v2296_v0 }
  0xe0   : > { %1265 = vmatpush2.msra.mxu0 %v1178_v9  ;;  %1490 = vmatpush2.msra.mxu1 %v1210_v10 }
  0xe1   : > { %689 = vmatmul.mubr.f32.gmra.mxu0 %v386_v11  ;;  %946 = vmatmul.mubr.f32.gmra.mxu1 %v386_v11 }
  0xe2   : > { %694 = vmatprep.mubr.f32.mxu0 %v2296_v0  ;;  %951 = vmatprep.mubr.f32.mxu1 %v2296_v0 }
  0xe3   : > { %1266 = vmatprep.subr.mxu0 %v2296_v0  ;;  %1491 = vmatprep.subr.mxu1 %v2296_v0 }
  0xe4   : > { %1267 = vmatpush2.msra.mxu0 %v1177_v12  ;;  %1492 = vmatpush2.msra.mxu1 %v1209_v13 }
  0xe5   : > { %695 = vmatmul.mubr.f32.gmra.mxu0 %v387_v14  ;;  %952 = vmatmul.mubr.f32.gmra.mxu1 %v387_v14 }
  0xe6   : > { %700 = vmatprep.mubr.f32.mxu0 %v2296_v0  ;;  %957 = vmatprep.mubr.f32.mxu1 %v2296_v0 }
  0xe7   : > { %1268 = vmatprep.subr.mxu0 %v2296_v0  ;;  %1493 = vmatprep.subr.mxu1 %v2296_v0 }
  0xe8   : > { %1269 = vmatpush2.msra.mxu0 %v1176_v15  ;;  %1494 = vmatpush2.msra.mxu1 %v1208_v16 }
  0xe9   : > { %701 = vmatmul.mubr.f32.gmra.mxu0 %v388_v17  ;;  %958 = vmatmul.mubr.f32.gmra.mxu1 %v388_v17 }
  0xea   : > { %706 = vmatprep.mubr.f32.mxu0 %v2296_v0  ;;  %963 = vmatprep.mubr.f32.mxu1 %v2296_v0 }
  0xeb   : > { %1270 = vmatprep.subr.mxu0 %v2296_v0  ;;  %1495 = vmatprep.subr.mxu1 %v2296_v0 }
  0xec   : > { %1271 = vmatpush2.msra.mxu0 %v1175_v18  ;;  %1496 = vmatpush2.msra.mxu1 %v1207_v19 }
  0xed   : > { %707 = vmatmul.mubr.f32.gmra.mxu0 %v389_v20  ;;  %964 = vmatmul.mubr.f32.gmra.mxu1 %v389_v20 }
  0xee   : > { %712 = vmatprep.mubr.f32.mxu0 %v2296_v0  ;;  %969 = vmatprep.mubr.f32.mxu1 %v2296_v0 }
  0xef   : > { %1272 = vmatprep.subr.mxu0 %v2296_v0  ;;  %1497 = vmatprep.subr.mxu1 %v2296_v0 }
  0xf0   : > { %1273 = vmatpush2.msra.mxu0 %v1174_v21  ;;  %1498 = vmatpush2.msra.mxu1 %v1206_v22 }
  0xf1   : > { %713 = vmatmul.mubr.f32.gmra.mxu0 %v390_v23  ;;  %970 = vmatmul.mubr.f32.gmra.mxu1 %v390_v23 }
  0xf2   : > { %718 = vmatprep.mubr.f32.mxu0 %v2296_v0  ;;  %975 = vmatprep.mubr.f32.mxu1 %v2296_v0 }
  0xf3   : > { %1274 = vmatprep.subr.mxu0 %v2296_v0  ;;  %1499 = vmatprep.subr.mxu1 %v2296_v0 }
  0xf4   : > { %1275 = vmatpush2.msra.mxu0 %v1173_v24  ;;  %1500 = vmatpush2.msra.mxu1 %v1205_v25 }
  0xf5   : > { %719 = vmatmul.mubr.f32.gmra.mxu0 %v391_v26  ;;  %976 = vmatmul.mubr.f32.gmra.mxu1 %v391_v26 }
  0xf6   : > { %724 = vmatprep.mubr.f32.mxu0 %v2296_v0  ;;  %981 = vmatprep.mubr.f32.mxu1 %v2296_v0 }
  0xf7   : > { %1276 = vmatprep.subr.mxu0 %v2296_v0  ;;  %1501 = vmatprep.subr.mxu1 %v2296_v0 }
  0xf8   : > { %1277 = vmatpush2.msra.mxu0 %v1172_v27  ;;  %1502 = vmatpush2.msra.mxu1 %v1204_v28 }
  0xf9   : > { %725 = vmatmul.mubr.f32.gmra.mxu0 %v392_v29  ;;  %982 = vmatmul.mubr.f32.gmra.mxu1 %v392_v29 }
  0xfa   : > { %730 = vmatprep.mubr.f32.mxu0 %v2296_v0  ;;  %987 = vmatprep.mubr.f32.mxu1 %v2296_v0 }
  0xfb   : > { %1278 = vmatprep.subr.mxu0 %v2296_v0  ;;  %1503 = vmatprep.subr.mxu1 %v2296_v0 }
  0xfc   : > { %1279 = vmatpush2.msra.mxu0 %v1171_v30  ;;  %1504 = vmatpush2.msra.mxu1 %v1203_v31 }
  0xfd   : > { %731 = vmatmul.mubr.f32.gmra.mxu0 %v393_v32  ;;  %988 = vmatmul.mubr.f32.gmra.mxu1 %v393_v32 }
  0xfe   : > { %1280 = vmatprep.subr.mxu0 %v2296_v0  ;;  %1505 = vmatprep.subr.mxu1 %v2296_v0 }
  0xff   : > { %1281 = vmatpush2.msra.mxu0 %v1170_v33  ;;  %1506 = vmatpush2.msra.mxu1 %v1202_v34 }
 0x141   : > { %v546_v46 = vpop.f32.mrf.mxu0  ;;  %v803_v47 = vpop.f32.mrf.mxu1 }
 0x142   : > { %v547_v0 = vadd.f32 %v546_v46, %v2646_v42  ;;  %v804_v48 = vadd.f32 %v803_v47, %v2648_v43 }
 0x143   : > { %v548_v49 = vpop.f32.mrf.mxu0  ;;  %v805_v50 = vpop.f32.mrf.mxu1 }
 0x144   : > { %v549_v51 = vadd.f32 %v548_v49, %v2650_v44  ;;  %v806_v52 = vadd.f32 %v805_v50, %v2652_v45  ;;  %v994_v57 = vmax.f32 %v547_v0, 0.0  ;;  %v996_v58 = vmax.f32 %v804_v48, 0.0 }
 0x145   : > { %v552_v53 = vpop.f32.mrf.mxu0  ;;  %v809_v54 = vpop.f32.mrf.mxu1 }
 0x146   : > { %v995_v55 = vmax.f32 %v549_v51, 0.0  ;;  %v997_v56 = vmax.f32 %v806_v52, 0.0  ;;  %v553_v59 = vadd.f32 %v552_v53, %v2646_v42  ;;  %v810_v60 = vadd.f32 %v809_v54, %v2648_v43 }
 0x147   : > { %v554_v61 = vpop.f32.mrf.mxu0  ;;  %v811_v62 = vpop.f32.mrf.mxu1 }
 0x148   : > { %v555_v63 = vadd.f32 %v554_v61, %v2650_v44  ;;  %v812_v1 = vadd.f32 %v811_v62, %v2652_v45  ;;  %1282 = vmatprep.mubr.f32.mxu0 %v995_v55  ;;  %1507 = vmatprep.mubr.f32.mxu1 %v997_v56  ;;  %v998_v6 = vmax.f32 %v553_v59, 0.0  ;;  %v1000_v7 = vmax.f32 %v810_v60, 0.0 }
 0x149   : > { %v558_v2 = vpop.f32.mrf.mxu0  ;;  %v815_v3 = vpop.f32.mrf.mxu1  ;;  %1283 = vmatmul.mubr.f32.vlgmr.msra.gmra.mxu0 %v994_v57  ;;  %1508 = vmatmul.mubr.f32.vlgmr.msra.gmra.mxu1 %v996_v58 }
 0x14a   : > { %v999_v4 = vmax.f32 %v555_v63, 0.0  ;;  %v1001_v5 = vmax.f32 %v812_v1, 0.0  ;;  %v559_v8 = vadd.f32 %v558_v2, %v2646_v42  ;;  %v816_v9 = vadd.f32 %v815_v3, %v2648_v43 }
 0x14b   : > { %v560_v10 = vpop.f32.mrf.mxu0  ;;  %v817_v11 = vpop.f32.mrf.mxu1 }
 0x14c   : > { %v561_v12 = vadd.f32 %v560_v10, %v2650_v44  ;;  %v818_v13 = vadd.f32 %v817_v11, %v2652_v45  ;;  %1287 = vmatprep.mubr.f32.mxu0 %v999_v4  ;;  %1512 = vmatprep.mubr.f32.mxu1 %v1001_v5  ;;  %v1002_v18 = vmax.f32 %v559_v8, 0.0  ;;  %v1004_v19 = vmax.f32 %v816_v9, 0.0 }
 0x14d   : > { %v564_v14 = vpop.f32.mrf.mxu0  ;;  %v821_v15 = vpop.f32.mrf.mxu1  ;;  %1288 = vmatmul.mubr.f32.gmra.mxu0 %v998_v6  ;;  %1513 = vmatmul.mubr.f32.gmra.mxu1 %v1000_v7 }
 0x14e   : > { %v1003_v16 = vmax.f32 %v561_v12, 0.0  ;;  %v1005_v17 = vmax.f32 %v818_v13, 0.0  ;;  %v565_v20 = vadd.f32 %v564_v14, %v2646_v42  ;;  %v822_v21 = vadd.f32 %v821_v15, %v2648_v43 }
 0x14f   : > { %v566_v22 = vpop.f32.mrf.mxu0  ;;  %v823_v23 = vpop.f32.mrf.mxu1 }
 0x150   : > { %v567_v24 = vadd.f32 %v566_v22, %v2650_v44  ;;  %v824_v25 = vadd.f32 %v823_v23, %v2652_v45  ;;  %1292 = vmatprep.mubr.f32.mxu0 %v1003_v16  ;;  %1517 = vmatprep.mubr.f32.mxu1 %v1005_v17  ;;  %v1006_v30 = vmax.f32 %v565_v20, 0.0  ;;  %v1008_v31 = vmax.f32 %v822_v21, 0.0 }
 0x151   : > { %v570_v26 = vpop.f32.mrf.mxu0  ;;  %v827_v27 = vpop.f32.mrf.mxu1  ;;  %1293 = vmatmul.mubr.f32.gmra.mxu0 %v1002_v18  ;;  %1518 = vmatmul.mubr.f32.gmra.mxu1 %v1004_v19 }
 0x152   : > { %v1007_v28 = vmax.f32 %v567_v24, 0.0  ;;  %v1009_v29 = vmax.f32 %v824_v25, 0.0  ;;  %v571_v32 = vadd.f32 %v570_v26, %v2646_v42  ;;  %v828_v33 = vadd.f32 %v827_v27, %v2648_v43 }
 0x153   : > { %v572_v34 = vpop.f32.mrf.mxu0  ;;  %v829_v35 = vpop.f32.mrf.mxu1 }
 0x154   : > { %v573_v36 = vadd.f32 %v572_v34, %v2650_v44  ;;  %v830_v37 = vadd.f32 %v829_v35, %v2652_v45  ;;  %1297 = vmatprep.mubr.f32.mxu0 %v1007_v28  ;;  %1522 = vmatprep.mubr.f32.mxu1 %v1009_v29  ;;  %v1010_v46 = vmax.f32 %v571_v32, 0.0  ;;  %v1012_v47 = vmax.f32 %v828_v33, 0.0 }
 0x155   : > { %v576_v38 = vpop.f32.mrf.mxu0  ;;  %v833_v39 = vpop.f32.mrf.mxu1  ;;  %1298 = vmatmul.mubr.f32.gmra.mxu0 %v1006_v30  ;;  %1523 = vmatmul.mubr.f32.gmra.mxu1 %v1008_v31 }
 0x156   : > { %v1011_v40 = vmax.f32 %v573_v36, 0.0  ;;  %v1013_v41 = vmax.f32 %v830_v37, 0.0  ;;  %v577_v0 = vadd.f32 %v576_v38, %v2646_v42  ;;  %v834_v48 = vadd.f32 %v833_v39, %v2648_v43 }
 0x157   : > { %v578_v49 = vpop.f32.mrf.mxu0  ;;  %v835_v50 = vpop.f32.mrf.mxu1 }
 0x158   : > { %v579_v51 = vadd.f32 %v578_v49, %v2650_v44  ;;  %v836_v52 = vadd.f32 %v835_v50, %v2652_v45  ;;  %1302 = vmatprep.mubr.f32.mxu0 %v1011_v40  ;;  %1527 = vmatprep.mubr.f32.mxu1 %v1013_v41  ;;  %v1014_v57 = vmax.f32 %v577_v0, 0.0  ;;  %v1016_v58 = vmax.f32 %v834_v48, 0.0 }
 0x159   : > { %v582_v53 = vpop.f32.mrf.mxu0  ;;  %v839_v54 = vpop.f32.mrf.mxu1  ;;  %1303 = vmatmul.mubr.f32.gmra.mxu0 %v1010_v46  ;;  %1528 = vmatmul.mubr.f32.gmra.mxu1 %v1012_v47 }
 0x15a   : > { %v1015_v55 = vmax.f32 %v579_v51, 0.0  ;;  %v1017_v56 = vmax.f32 %v836_v52, 0.0  ;;  %v583_v59 = vadd.f32 %v582_v53, %v2646_v42  ;;  %v840_v60 = vadd.f32 %v839_v54, %v2648_v43 }
 0x15b   : > { %v584_v61 = vpop.f32.mrf.mxu0  ;;  %v841_v62 = vpop.f32.mrf.mxu1 }
 0x15c   : > { %v585_v63 = vadd.f32 %v584_v61, %v2650_v44  ;;  %v842_v1 = vadd.f32 %v841_v62, %v2652_v45  ;;  %1307 = vmatprep.mubr.f32.mxu0 %v1015_v55  ;;  %1532 = vmatprep.mubr.f32.mxu1 %v1017_v56  ;;  %v1018_v6 = vmax.f32 %v583_v59, 0.0  ;;  %v1020_v7 = vmax.f32 %v840_v60, 0.0 }
 0x15d   : > { %v588_v2 = vpop.f32.mrf.mxu0  ;;  %v845_v3 = vpop.f32.mrf.mxu1  ;;  %1308 = vmatmul.mubr.f32.gmra.mxu0 %v1014_v57  ;;  %1533 = vmatmul.mubr.f32.gmra.mxu1 %v1016_v58 }
 0x15e   : > { %v1019_v4 = vmax.f32 %v585_v63, 0.0  ;;  %v1021_v5 = vmax.f32 %v842_v1, 0.0  ;;  %v589_v8 = vadd.f32 %v588_v2, %v2646_v42  ;;  %v846_v9 = vadd.f32 %v845_v3, %v2648_v43 }
 0x15f   : > { %v590_v10 = vpop.f32.mrf.mxu0  ;;  %v847_v11 = vpop.f32.mrf.mxu1 }
 0x160   : > { %v591_v12 = vadd.f32 %v590_v10, %v2650_v44  ;;  %v848_v13 = vadd.f32 %v847_v11, %v2652_v45  ;;  %1312 = vmatprep.mubr.f32.mxu0 %v1019_v4  ;;  %1537 = vmatprep.mubr.f32.mxu1 %v1021_v5  ;;  %v1022_v18 = vmax.f32 %v589_v8, 0.0  ;;  %v1024_v19 = vmax.f32 %v846_v9, 0.0 }
 0x161   : > { %v594_v14 = vpop.f32.mrf.mxu0  ;;  %v851_v15 = vpop.f32.mrf.mxu1  ;;  %1313 = vmatmul.mubr.f32.gmra.mxu0 %v1018_v6  ;;  %1538 = vmatmul.mubr.f32.gmra.mxu1 %v1020_v7 }
 0x162   : > { %v1023_v16 = vmax.f32 %v591_v12, 0.0  ;;  %v1025_v17 = vmax.f32 %v848_v13, 0.0  ;;  %v595_v20 = vadd.f32 %v594_v14, %v2646_v42  ;;  %v852_v21 = vadd.f32 %v851_v15, %v2648_v43 }
 0x163   : > { %v596_v22 = vpop.f32.mrf.mxu0  ;;  %v853_v23 = vpop.f32.mrf.mxu1 }
 0x164   : > { %v597_v24 = vadd.f32 %v596_v22, %v2650_v44  ;;  %v854_v25 = vadd.f32 %v853_v23, %v2652_v45  ;;  %1317 = vmatprep.mubr.f32.mxu0 %v1023_v16  ;;  %1542 = vmatprep.mubr.f32.mxu1 %v1025_v17  ;;  %v1026_v30 = vmax.f32 %v595_v20, 0.0  ;;  %v1028_v31 = vmax.f32 %v852_v21, 0.0 }
 0x165   : > { %v600_v26 = vpop.f32.mrf.mxu0  ;;  %v857_v27 = vpop.f32.mrf.mxu1  ;;  %1318 = vmatmul.mubr.f32.gmra.mxu0 %v1022_v18  ;;  %1543 = vmatmul.mubr.f32.gmra.mxu1 %v1024_v19 }
 0x166   : > { %v1027_v28 = vmax.f32 %v597_v24, 0.0  ;;  %v1029_v29 = vmax.f32 %v854_v25, 0.0  ;;  %v601_v32 = vadd.f32 %v600_v26, %v2646_v42  ;;  %v858_v33 = vadd.f32 %v857_v27, %v2648_v43 }
 0x167   : > { %v602_v34 = vpop.f32.mrf.mxu0  ;;  %v859_v35 = vpop.f32.mrf.mxu1 }
 0x168   : > { %v603_v36 = vadd.f32 %v602_v34, %v2650_v44  ;;  %v860_v37 = vadd.f32 %v859_v35, %v2652_v45  ;;  %1322 = vmatprep.mubr.f32.mxu0 %v1027_v28  ;;  %1547 = vmatprep.mubr.f32.mxu1 %v1029_v29  ;;  %v1030_v46 = vmax.f32 %v601_v32, 0.0  ;;  %v1032_v47 = vmax.f32 %v858_v33, 0.0 }
 0x169   : > { %v606_v38 = vpop.f32.mrf.mxu0  ;;  %v863_v39 = vpop.f32.mrf.mxu1  ;;  %1323 = vmatmul.mubr.f32.gmra.mxu0 %v1026_v30  ;;  %1548 = vmatmul.mubr.f32.gmra.mxu1 %v1028_v31 }
 0x16a   : > { %v1031_v40 = vmax.f32 %v603_v36, 0.0  ;;  %v1033_v41 = vmax.f32 %v860_v37, 0.0  ;;  %v607_v0 = vadd.f32 %v606_v38, %v2646_v42  ;;  %v864_v48 = vadd.f32 %v863_v39, %v2648_v43 }
 0x16b   : > { %v608_v49 = vpop.f32.mrf.mxu0  ;;  %v865_v50 = vpop.f32.mrf.mxu1 }
 0x16c   : > { %v609_v51 = vadd.f32 %v608_v49, %v2650_v44  ;;  %v866_v52 = vadd.f32 %v865_v50, %v2652_v45  ;;  %1327 = vmatprep.mubr.f32.mxu0 %v1031_v40  ;;  %1552 = vmatprep.mubr.f32.mxu1 %v1033_v41  ;;  %v1034_v57 = vmax.f32 %v607_v0, 0.0  ;;  %v1036_v58 = vmax.f32 %v864_v48, 0.0 }
 0x16d   : > { %v612_v53 = vpop.f32.mrf.mxu0  ;;  %v869_v54 = vpop.f32.mrf.mxu1  ;;  %1328 = vmatmul.mubr.f32.gmra.mxu0 %v1030_v46  ;;  %1553 = vmatmul.mubr.f32.gmra.mxu1 %v1032_v47 }
 0x16e   : > { %v1035_v55 = vmax.f32 %v609_v51, 0.0  ;;  %v1037_v56 = vmax.f32 %v866_v52, 0.0  ;;  %v613_v59 = vadd.f32 %v612_v53, %v2646_v42  ;;  %v870_v60 = vadd.f32 %v869_v54, %v2648_v43 }
 0x16f   : > { %v614_v61 = vpop.f32.mrf.mxu0  ;;  %v871_v62 = vpop.f32.mrf.mxu1 }
 0x170   : > { %v615_v63 = vadd.f32 %v614_v61, %v2650_v44  ;;  %v872_v1 = vadd.f32 %v871_v62, %v2652_v45  ;;  %1332 = vmatprep.mubr.f32.mxu0 %v1035_v55  ;;  %1557 = vmatprep.mubr.f32.mxu1 %v1037_v56  ;;  %v1038_v6 = vmax.f32 %v613_v59, 0.0  ;;  %v1040_v7 = vmax.f32 %v870_v60, 0.0 }
 0x171   : > { %v618_v2 = vpop.f32.mrf.mxu0  ;;  %v875_v3 = vpop.f32.mrf.mxu1  ;;  %1333 = vmatmul.mubr.f32.gmra.mxu0 %v1034_v57  ;;  %1558 = vmatmul.mubr.f32.gmra.mxu1 %v1036_v58 }
 0x172   : > { %v1039_v4 = vmax.f32 %v615_v63, 0.0  ;;  %v1041_v5 = vmax.f32 %v872_v1, 0.0  ;;  %v619_v8 = vadd.f32 %v618_v2, %v2646_v42  ;;  %v876_v9 = vadd.f32 %v875_v3, %v2648_v43 }
 0x173   : > { %v620_v10 = vpop.f32.mrf.mxu0  ;;  %v877_v11 = vpop.f32.mrf.mxu1 }
 0x174   : > { %v621_v12 = vadd.f32 %v620_v10, %v2650_v44  ;;  %v878_v13 = vadd.f32 %v877_v11, %v2652_v45  ;;  %1337 = vmatprep.mubr.f32.mxu0 %v1039_v4  ;;  %1562 = vmatprep.mubr.f32.mxu1 %v1041_v5  ;;  %v1042_v18 = vmax.f32 %v619_v8, 0.0  ;;  %v1044_v19 = vmax.f32 %v876_v9, 0.0 }
 0x175   : > { %v624_v14 = vpop.f32.mrf.mxu0  ;;  %v881_v15 = vpop.f32.mrf.mxu1  ;;  %1338 = vmatmul.mubr.f32.gmra.mxu0 %v1038_v6  ;;  %1563 = vmatmul.mubr.f32.gmra.mxu1 %v1040_v7 }
 0x176   : > { %v1043_v16 = vmax.f32 %v621_v12, 0.0  ;;  %v1045_v17 = vmax.f32 %v878_v13, 0.0  ;;  %v625_v20 = vadd.f32 %v624_v14, %v2646_v42  ;;  %v882_v21 = vadd.f32 %v881_v15, %v2648_v43 }
 0x177   : > { %v626_v22 = vpop.f32.mrf.mxu0  ;;  %v883_v23 = vpop.f32.mrf.mxu1 }
 0x178   : > { %v627_v24 = vadd.f32 %v626_v22, %v2650_v44  ;;  %v884_v25 = vadd.f32 %v883_v23, %v2652_v45  ;;  %1342 = vmatprep.mubr.f32.mxu0 %v1043_v16  ;;  %1567 = vmatprep.mubr.f32.mxu1 %v1045_v17  ;;  %v1046_v30 = vmax.f32 %v625_v20, 0.0  ;;  %v1048_v31 = vmax.f32 %v882_v21, 0.0 }
 0x179   : > { %v630_v26 = vpop.f32.mrf.mxu0  ;;  %v887_v27 = vpop.f32.mrf.mxu1  ;;  %1343 = vmatmul.mubr.f32.gmra.mxu0 %v1042_v18  ;;  %1568 = vmatmul.mubr.f32.gmra.mxu1 %v1044_v19 }
 0x17a   : > { %v1047_v28 = vmax.f32 %v627_v24, 0.0  ;;  %v1049_v29 = vmax.f32 %v884_v25, 0.0  ;;  %v631_v32 = vadd.f32 %v630_v26, %v2646_v42  ;;  %v888_v33 = vadd.f32 %v887_v27, %v2648_v43 }
 0x17b   : > { %v632_v34 = vpop.f32.mrf.mxu0  ;;  %v889_v35 = vpop.f32.mrf.mxu1 }
 0x17c   : > { %v633_v36 = vadd.f32 %v632_v34, %v2650_v44  ;;  %v890_v37 = vadd.f32 %v889_v35, %v2652_v45  ;;  %1347 = vmatprep.mubr.f32.mxu0 %v1047_v28  ;;  %1572 = vmatprep.mubr.f32.mxu1 %v1049_v29  ;;  %v1050_v46 = vmax.f32 %v631_v32, 0.0  ;;  %v1052_v47 = vmax.f32 %v888_v33, 0.0 }
 0x17d   : > { %v636_v38 = vpop.f32.mrf.mxu0  ;;  %v893_v39 = vpop.f32.mrf.mxu1  ;;  %1348 = vmatmul.mubr.f32.gmra.mxu0 %v1046_v30  ;;  %1573 = vmatmul.mubr.f32.gmra.mxu1 %v1048_v31 }
 0x17e   : > { %v1051_v40 = vmax.f32 %v633_v36, 0.0  ;;  %v1053_v41 = vmax.f32 %v890_v37, 0.0  ;;  %v637_v0 = vadd.f32 %v636_v38, %v2646_v42  ;;  %v894_v48 = vadd.f32 %v893_v39, %v2648_v43 }
 0x17f   : > { %v638_v49 = vpop.f32.mrf.mxu0  ;;  %v895_v50 = vpop.f32.mrf.mxu1 }
 0x180   : > { %v639_v51 = vadd.f32 %v638_v49, %v2650_v44  ;;  %v896_v52 = vadd.f32 %v895_v50, %v2652_v45  ;;  %1352 = vmatprep.mubr.f32.mxu0 %v1051_v40  ;;  %1577 = vmatprep.mubr.f32.mxu1 %v1053_v41  ;;  %v1054_v57 = vmax.f32 %v637_v0, 0.0  ;;  %v1056_v58 = vmax.f32 %v894_v48, 0.0 }
 0x181   : > { %v642_v53 = vpop.f32.mrf.mxu0  ;;  %v899_v54 = vpop.f32.mrf.mxu1  ;;  %1353 = vmatmul.mubr.f32.gmra.mxu0 %v1050_v46  ;;  %1578 = vmatmul.mubr.f32.gmra.mxu1 %v1052_v47 }
 0x182   : > { %v1055_v55 = vmax.f32 %v639_v51, 0.0  ;;  %v1057_v56 = vmax.f32 %v896_v52, 0.0  ;;  %v643_v59 = vadd.f32 %v642_v53, %v2646_v42  ;;  %v900_v60 = vadd.f32 %v899_v54, %v2648_v43 }
 0x183   : > { %v644_v61 = vpop.f32.mrf.mxu0  ;;  %v901_v62 = vpop.f32.mrf.mxu1 }
 0x184   : > { %v645_v63 = vadd.f32 %v644_v61, %v2650_v44  ;;  %v902_v1 = vadd.f32 %v901_v62, %v2652_v45  ;;  %1357 = vmatprep.mubr.f32.mxu0 %v1055_v55  ;;  %1582 = vmatprep.mubr.f32.mxu1 %v1057_v56  ;;  %v1058_v6 = vmax.f32 %v643_v59, 0.0  ;;  %v1060_v7 = vmax.f32 %v900_v60, 0.0 }
 0x185   : > { %v648_v2 = vpop.f32.mrf.mxu0  ;;  %v905_v3 = vpop.f32.mrf.mxu1  ;;  %1358 = vmatmul.mubr.f32.gmra.mxu0 %v1054_v57  ;;  %1583 = vmatmul.mubr.f32.gmra.mxu1 %v1056_v58 }
 0x186   : > { %v1059_v4 = vmax.f32 %v645_v63, 0.0  ;;  %v1061_v5 = vmax.f32 %v902_v1, 0.0  ;;  %v649_v8 = vadd.f32 %v648_v2, %v2646_v42  ;;  %v906_v9 = vadd.f32 %v905_v3, %v2648_v43 }
 0x187   : > { %v650_v10 = vpop.f32.mrf.mxu0  ;;  %v907_v11 = vpop.f32.mrf.mxu1 }
 0x188   : > { %v651_v12 = vadd.f32 %v650_v10, %v2650_v44  ;;  %v908_v13 = vadd.f32 %v907_v11, %v2652_v45  ;;  %1362 = vmatprep.mubr.f32.mxu0 %v1059_v4  ;;  %1587 = vmatprep.mubr.f32.mxu1 %v1061_v5  ;;  %v1062_v18 = vmax.f32 %v649_v8, 0.0  ;;  %v1064_v19 = vmax.f32 %v906_v9, 0.0 }
 0x189   : > { %v654_v14 = vpop.f32.mrf.mxu0  ;;  %v911_v15 = vpop.f32.mrf.mxu1  ;;  %1363 = vmatmul.mubr.f32.gmra.mxu0 %v1058_v6  ;;  %1588 = vmatmul.mubr.f32.gmra.mxu1 %v1060_v7 }
 0x18a   : > { %v1063_v16 = vmax.f32 %v651_v12, 0.0  ;;  %v1065_v17 = vmax.f32 %v908_v13, 0.0  ;;  %v655_v20 = vadd.f32 %v654_v14, %v2646_v42  ;;  %v912_v21 = vadd.f32 %v911_v15, %v2648_v43 }
 0x18b   : > { %v656_v22 = vpop.f32.mrf.mxu0  ;;  %v913_v23 = vpop.f32.mrf.mxu1 }
 0x18c   : > { %v657_v24 = vadd.f32 %v656_v22, %v2650_v44  ;;  %v914_v25 = vadd.f32 %v913_v23, %v2652_v45  ;;  %1367 = vmatprep.mubr.f32.mxu0 %v1063_v16  ;;  %1592 = vmatprep.mubr.f32.mxu1 %v1065_v17  ;;  %v1066_v30 = vmax.f32 %v655_v20, 0.0  ;;  %v1068_v31 = vmax.f32 %v912_v21, 0.0 }
 0x18d   : > { %v660_v26 = vpop.f32.mrf.mxu0  ;;  %v917_v27 = vpop.f32.mrf.mxu1  ;;  %1368 = vmatmul.mubr.f32.gmra.mxu0 %v1062_v18  ;;  %1593 = vmatmul.mubr.f32.gmra.mxu1 %v1064_v19 }
 0x18e   : > { %v1067_v28 = vmax.f32 %v657_v24, 0.0  ;;  %v1069_v29 = vmax.f32 %v914_v25, 0.0  ;;  %v661_v32 = vadd.f32 %v660_v26, %v2646_v42  ;;  %v918_v33 = vadd.f32 %v917_v27, %v2648_v43 }
 0x18f   : > { %v662_v34 = vpop.f32.mrf.mxu0  ;;  %v919_v35 = vpop.f32.mrf.mxu1 }
 0x190   : > { %v663_v36 = vadd.f32 %v662_v34, %v2650_v44  ;;  %v920_v37 = vadd.f32 %v919_v35, %v2652_v45  ;;  %1372 = vmatprep.mubr.f32.mxu0 %v1067_v28  ;;  %1597 = vmatprep.mubr.f32.mxu1 %v1069_v29  ;;  %v1070_v46 = vmax.f32 %v661_v32, 0.0  ;;  %v1072_v47 = vmax.f32 %v918_v33, 0.0 }
 0x191   : > { %v666_v38 = vpop.f32.mrf.mxu0  ;;  %v923_v39 = vpop.f32.mrf.mxu1  ;;  %1373 = vmatmul.mubr.f32.gmra.mxu0 %v1066_v30  ;;  %1598 = vmatmul.mubr.f32.gmra.mxu1 %v1068_v31 }
 0x192   : > { %v1071_v40 = vmax.f32 %v663_v36, 0.0  ;;  %v1073_v41 = vmax.f32 %v920_v37, 0.0  ;;  %v667_v0 = vadd.f32 %v666_v38, %v2646_v42  ;;  %v924_v48 = vadd.f32 %v923_v39, %v2648_v43 }
 0x193   : > { %v668_v49 = vpop.f32.mrf.mxu0  ;;  %v925_v50 = vpop.f32.mrf.mxu1 }
 0x194   : > { %v669_v51 = vadd.f32 %v668_v49, %v2650_v44  ;;  %v926_v52 = vadd.f32 %v925_v50, %v2652_v45  ;;  %1377 = vmatprep.mubr.f32.mxu0 %v1071_v40  ;;  %1602 = vmatprep.mubr.f32.mxu1 %v1073_v41  ;;  %v1074_v57 = vmax.f32 %v667_v0, 0.0  ;;  %v1076_v58 = vmax.f32 %v924_v48, 0.0 }
 0x195   : > { %v672_v53 = vpop.f32.mrf.mxu0  ;;  %v929_v54 = vpop.f32.mrf.mxu1  ;;  %1378 = vmatmul.mubr.f32.gmra.mxu0 %v1070_v46  ;;  %1603 = vmatmul.mubr.f32.gmra.mxu1 %v1072_v47 }
 0x196   : > { %v1075_v55 = vmax.f32 %v669_v51, 0.0  ;;  %v1077_v56 = vmax.f32 %v926_v52, 0.0  ;;  %v673_v59 = vadd.f32 %v672_v53, %v2646_v42  ;;  %v930_v60 = vadd.f32 %v929_v54, %v2648_v43 }
 0x197   : > { %v674_v61 = vpop.f32.mrf.mxu0  ;;  %v931_v62 = vpop.f32.mrf.mxu1 }
 0x198   : > { %v675_v63 = vadd.f32 %v674_v61, %v2650_v44  ;;  %v932_v1 = vadd.f32 %v931_v62, %v2652_v45  ;;  %1382 = vmatprep.mubr.f32.mxu0 %v1075_v55  ;;  %1607 = vmatprep.mubr.f32.mxu1 %v1077_v56  ;;  %v1078_v6 = vmax.f32 %v673_v59, 0.0  ;;  %v1080_v7 = vmax.f32 %v930_v60, 0.0 }
 0x199   : > { %v678_v2 = vpop.f32.mrf.mxu0  ;;  %v935_v3 = vpop.f32.mrf.mxu1  ;;  %1383 = vmatmul.mubr.f32.gmra.mxu0 %v1074_v57  ;;  %1608 = vmatmul.mubr.f32.gmra.mxu1 %v1076_v58 }
 0x19a   : > { %v1079_v4 = vmax.f32 %v675_v63, 0.0  ;;  %v1081_v5 = vmax.f32 %v932_v1, 0.0  ;;  %v679_v8 = vadd.f32 %v678_v2, %v2646_v42  ;;  %v936_v9 = vadd.f32 %v935_v3, %v2648_v43 }
 0x19b   : > { %v680_v10 = vpop.f32.mrf.mxu0  ;;  %v937_v11 = vpop.f32.mrf.mxu1 }
 0x19c   : > { %v681_v12 = vadd.f32 %v680_v10, %v2650_v44  ;;  %v938_v13 = vadd.f32 %v937_v11, %v2652_v45  ;;  %1387 = vmatprep.mubr.f32.mxu0 %v1079_v4  ;;  %1612 = vmatprep.mubr.f32.mxu1 %v1081_v5  ;;  %v1082_v18 = vmax.f32 %v679_v8, 0.0  ;;  %v1084_v19 = vmax.f32 %v936_v9, 0.0 }
 0x19d   : > { %v684_v14 = vpop.f32.mrf.mxu0  ;;  %v941_v15 = vpop.f32.mrf.mxu1  ;;  %1388 = vmatmul.mubr.f32.gmra.mxu0 %v1078_v6  ;;  %1613 = vmatmul.mubr.f32.gmra.mxu1 %v1080_v7 }
 0x19e   : > { %v1083_v16 = vmax.f32 %v681_v12, 0.0  ;;  %v1085_v17 = vmax.f32 %v938_v13, 0.0  ;;  %v685_v20 = vadd.f32 %v684_v14, %v2646_v42  ;;  %v942_v21 = vadd.f32 %v941_v15, %v2648_v43 }
 0x19f   : > { %v686_v22 = vpop.f32.mrf.mxu0  ;;  %v943_v23 = vpop.f32.mrf.mxu1 }
 0x1a0   : > { %v687_v24 = vadd.f32 %v686_v22, %v2650_v44  ;;  %v944_v25 = vadd.f32 %v943_v23, %v2652_v45  ;;  %1392 = vmatprep.mubr.f32.mxu0 %v1083_v16  ;;  %1617 = vmatprep.mubr.f32.mxu1 %v1085_v17  ;;  %v1086_v30 = vmax.f32 %v685_v20, 0.0  ;;  %v1088_v31 = vmax.f32 %v942_v21, 0.0 }
 0x1a1   : > { %v690_v26 = vpop.f32.mrf.mxu0  ;;  %v947_v27 = vpop.f32.mrf.mxu1  ;;  %1393 = vmatmul.mubr.f32.gmra.mxu0 %v1082_v18  ;;  %1618 = vmatmul.mubr.f32.gmra.mxu1 %v1084_v19 }
 0x1a2   : > { %v1087_v28 = vmax.f32 %v687_v24, 0.0  ;;  %v1089_v29 = vmax.f32 %v944_v25, 0.0  ;;  %v691_v32 = vadd.f32 %v690_v26, %v2646_v42  ;;  %v948_v33 = vadd.f32 %v947_v27, %v2648_v43 }
 0x1a3   : > { %v692_v34 = vpop.f32.mrf.mxu0  ;;  %v949_v35 = vpop.f32.mrf.mxu1 }
 0x1a4   : > { %v693_v36 = vadd.f32 %v692_v34, %v2650_v44  ;;  %v950_v37 = vadd.f32 %v949_v35, %v2652_v45  ;;  %1397 = vmatprep.mubr.f32.mxu0 %v1087_v28  ;;  %1622 = vmatprep.mubr.f32.mxu1 %v1089_v29  ;;  %v1090_v46 = vmax.f32 %v691_v32, 0.0  ;;  %v1092_v47 = vmax.f32 %v948_v33, 0.0 }
 0x1a5   : > { %v696_v38 = vpop.f32.mrf.mxu0  ;;  %v953_v39 = vpop.f32.mrf.mxu1  ;;  %1398 = vmatmul.mubr.f32.gmra.mxu0 %v1086_v30  ;;  %1623 = vmatmul.mubr.f32.gmra.mxu1 %v1088_v31 }
 0x1a6   : > { %v1091_v40 = vmax.f32 %v693_v36, 0.0  ;;  %v1093_v41 = vmax.f32 %v950_v37, 0.0  ;;  %v697_v0 = vadd.f32 %v696_v38, %v2646_v42  ;;  %v954_v48 = vadd.f32 %v953_v39, %v2648_v43 }
 0x1a7   : > { %v698_v49 = vpop.f32.mrf.mxu0  ;;  %v955_v50 = vpop.f32.mrf.mxu1 }
 0x1a8   : > { %v699_v51 = vadd.f32 %v698_v49, %v2650_v44  ;;  %v956_v52 = vadd.f32 %v955_v50, %v2652_v45  ;;  %1402 = vmatprep.mubr.f32.mxu0 %v1091_v40  ;;  %1627 = vmatprep.mubr.f32.mxu1 %v1093_v41  ;;  %v1094_v57 = vmax.f32 %v697_v0, 0.0  ;;  %v1096_v58 = vmax.f32 %v954_v48, 0.0 }
 0x1a9   : > { %v702_v53 = vpop.f32.mrf.mxu0  ;;  %v959_v54 = vpop.f32.mrf.mxu1  ;;  %1403 = vmatmul.mubr.f32.gmra.mxu0 %v1090_v46  ;;  %1628 = vmatmul.mubr.f32.gmra.mxu1 %v1092_v47 }
 0x1aa   : > { %v1095_v55 = vmax.f32 %v699_v51, 0.0  ;;  %v1097_v56 = vmax.f32 %v956_v52, 0.0  ;;  %v703_v59 = vadd.f32 %v702_v53, %v2646_v42  ;;  %v960_v60 = vadd.f32 %v959_v54, %v2648_v43 }
 0x1ab   : > { %v704_v61 = vpop.f32.mrf.mxu0  ;;  %v961_v62 = vpop.f32.mrf.mxu1 }
 0x1ac   : > { %v705_v63 = vadd.f32 %v704_v61, %v2650_v44  ;;  %v962_v1 = vadd.f32 %v961_v62, %v2652_v45  ;;  %1407 = vmatprep.mubr.f32.mxu0 %v1095_v55  ;;  %1632 = vmatprep.mubr.f32.mxu1 %v1097_v56  ;;  %v1098_v6 = vmax.f32 %v703_v59, 0.0  ;;  %v1100_v7 = vmax.f32 %v960_v60, 0.0 }
 0x1ad   : > { %v708_v2 = vpop.f32.mrf.mxu0  ;;  %v965_v3 = vpop.f32.mrf.mxu1  ;;  %1408 = vmatmul.mubr.f32.gmra.mxu0 %v1094_v57  ;;  %1633 = vmatmul.mubr.f32.gmra.mxu1 %v1096_v58 }
 0x1ae   : > { %v1099_v4 = vmax.f32 %v705_v63, 0.0  ;;  %v1101_v5 = vmax.f32 %v962_v1, 0.0  ;;  %v709_v8 = vadd.f32 %v708_v2, %v2646_v42  ;;  %v966_v9 = vadd.f32 %v965_v3, %v2648_v43 }
 0x1af   : > { %v710_v10 = vpop.f32.mrf.mxu0  ;;  %v967_v11 = vpop.f32.mrf.mxu1 }
 0x1b0   : > { %v711_v12 = vadd.f32 %v710_v10, %v2650_v44  ;;  %v968_v13 = vadd.f32 %v967_v11, %v2652_v45  ;;  %1412 = vmatprep.mubr.f32.mxu0 %v1099_v4  ;;  %1637 = vmatprep.mubr.f32.mxu1 %v1101_v5  ;;  %v1102_v18 = vmax.f32 %v709_v8, 0.0  ;;  %v1104_v19 = vmax.f32 %v966_v9, 0.0 }
 0x1b1   : > { %v714_v14 = vpop.f32.mrf.mxu0  ;;  %v971_v15 = vpop.f32.mrf.mxu1  ;;  %1413 = vmatmul.mubr.f32.gmra.mxu0 %v1098_v6  ;;  %1638 = vmatmul.mubr.f32.gmra.mxu1 %v1100_v7 }
 0x1b2   : > { %v1103_v16 = vmax.f32 %v711_v12, 0.0  ;;  %v1105_v17 = vmax.f32 %v968_v13, 0.0  ;;  %v715_v20 = vadd.f32 %v714_v14, %v2646_v42  ;;  %v972_v21 = vadd.f32 %v971_v15, %v2648_v43 }
 0x1b3   : > { %v716_v22 = vpop.f32.mrf.mxu0  ;;  %v973_v23 = vpop.f32.mrf.mxu1 }
 0x1b4   : > { %v717_v24 = vadd.f32 %v716_v22, %v2650_v44  ;;  %v974_v25 = vadd.f32 %v973_v23, %v2652_v45  ;;  %1417 = vmatprep.mubr.f32.mxu0 %v1103_v16  ;;  %1642 = vmatprep.mubr.f32.mxu1 %v1105_v17  ;;  %v1106_v30 = vmax.f32 %v715_v20, 0.0  ;;  %v1108_v31 = vmax.f32 %v972_v21, 0.0 }
 0x1b5   : > { %v720_v26 = vpop.f32.mrf.mxu0  ;;  %v977_v27 = vpop.f32.mrf.mxu1  ;;  %1418 = vmatmul.mubr.f32.gmra.mxu0 %v1102_v18  ;;  %1643 = vmatmul.mubr.f32.gmra.mxu1 %v1104_v19 }
 0x1b6   : > { %v1107_v28 = vmax.f32 %v717_v24, 0.0  ;;  %v1109_v29 = vmax.f32 %v974_v25, 0.0  ;;  %v721_v32 = vadd.f32 %v720_v26, %v2646_v42  ;;  %v978_v33 = vadd.f32 %v977_v27, %v2648_v43 }
 0x1b7   : > { %v722_v34 = vpop.f32.mrf.mxu0  ;;  %v979_v35 = vpop.f32.mrf.mxu1 }
 0x1b8   : > { %v723_v36 = vadd.f32 %v722_v34, %v2650_v44  ;;  %v980_v37 = vadd.f32 %v979_v35, %v2652_v45  ;;  %1422 = vmatprep.mubr.f32.mxu0 %v1107_v28  ;;  %1647 = vmatprep.mubr.f32.mxu1 %v1109_v29  ;;  %v1110_v46 = vmax.f32 %v721_v32, 0.0  ;;  %v1112_v47 = vmax.f32 %v978_v33, 0.0 }
 0x1b9   : > { %v726_v38 = vpop.f32.mrf.mxu0  ;;  %v983_v39 = vpop.f32.mrf.mxu1  ;;  %1423 = vmatmul.mubr.f32.gmra.mxu0 %v1106_v30  ;;  %1648 = vmatmul.mubr.f32.gmra.mxu1 %v1108_v31 }
 0x1ba   : > { %v1111_v40 = vmax.f32 %v723_v36, 0.0  ;;  %v1113_v41 = vmax.f32 %v980_v37, 0.0  ;;  %v727_v0 = vadd.f32 %v726_v38, %v2646_v42  ;;  %v984_v48 = vadd.f32 %v983_v39, %v2648_v43 }
 0x1bb   : > { %v728_v49 = vpop.f32.mrf.mxu0  ;;  %v985_v50 = vpop.f32.mrf.mxu1 }
 0x1bc   : > { %v729_v51 = vadd.f32 %v728_v49, %v2650_v44  ;;  %v986_v52 = vadd.f32 %v985_v50, %v2652_v45  ;;  %1427 = vmatprep.mubr.f32.mxu0 %v1111_v40  ;;  %1652 = vmatprep.mubr.f32.mxu1 %v1113_v41  ;;  %v1114_v57 = vmax.f32 %v727_v0, 0.0  ;;  %v1116_v58 = vmax.f32 %v984_v48, 0.0 }
 0x1bd   : > { %v732_v53 = vpop.f32.mrf.mxu0  ;;  %v989_v54 = vpop.f32.mrf.mxu1  ;;  %1428 = vmatmul.mubr.f32.gmra.mxu0 %v1110_v46  ;;  %1653 = vmatmul.mubr.f32.gmra.mxu1 %v1112_v47 }
 0x1be   : > { %v1115_v55 = vmax.f32 %v729_v51, 0.0  ;;  %v1117_v56 = vmax.f32 %v986_v52, 0.0  ;;  %v733_v59 = vadd.f32 %v732_v53, %v2646_v42  ;;  %v990_v60 = vadd.f32 %v989_v54, %v2648_v43 }
 0x1bf   : > { %v734_v61 = vpop.f32.mrf.mxu0  ;;  %v991_v62 = vpop.f32.mrf.mxu1 }
 0x1c0   : > { %v735_v63 = vadd.f32 %v734_v61, %v2650_v44  ;;  %v992_v1 = vadd.f32 %v991_v62, %v2652_v45  ;;  %1432 = vmatprep.mubr.f32.mxu0 %v1115_v55  ;;  %1657 = vmatprep.mubr.f32.mxu1 %v1117_v56  ;;  %v1118_v4 = vmax.f32 %v733_v59, 0.0  ;;  %v1120_v5 = vmax.f32 %v990_v60, 0.0  ;;  %v2785_v44 = vld [vmem:[%s2914_s4] ss:$0 sm:$0xff] }
 0x1c1   : > { %1433 = vmatmul.mubr.f32.gmra.mxu0 %v1114_v57  ;;  %1658 = vmatmul.mubr.f32.gmra.mxu1 %v1116_v58 }
 0x1c2   : > { %v1119_v2 = vmax.f32 %v735_v63, 0.0  ;;  %v1121_v3 = vmax.f32 %v992_v1, 0.0 }
 0x1c4   : > { %1437 = vmatprep.mubr.f32.mxu0 %v1119_v2  ;;  %1662 = vmatprep.mubr.f32.mxu1 %v1121_v3 }
 0x1c5   : > { %1438 = vmatmul.mubr.f32.gmra.mxu0 %v1118_v4  ;;  %1663 = vmatmul.mubr.f32.gmra.mxu1 %v1120_v5 }
 0x209   : > { %v1284_v42 = vpop.f32.mrf.mxu0  ;;  %v1509_v43 = vpop.f32.mrf.mxu1 }
 0x20a   : > { %v1510_v45 = vadd.f32 %v1509_v43, %v1284_v42 }
 0x20b   : > { %v1286_v6 = vpop.f32.mrf.mxu0  ;;  %v1511_v7 = vpop.f32.mrf.mxu1 }
 0x20c   : > { %v1774_v8 = vadd.f32 %v2785_v44, %v1510_v45 }
 0x20d   : > { %v1289_v9 = vpop.f32.mrf.mxu0  ;;  %v1514_v10 = vpop.f32.mrf.mxu1 }
 0x20e   : > { %1806 = vst [vmem:[%s2790_s30] sm:$0xff] %v1774_v8  ;;  %v1515_v11 = vadd.f32 %v1514_v10, %v1289_v9 }
 0x20f   : > { %v1291_v12 = vpop.f32.mrf.mxu0  ;;  %v1516_v13 = vpop.f32.mrf.mxu1 }
 0x210   : > { %v1775_v14 = vadd.f32 %v2785_v44, %v1515_v11 }
 0x211   : > { %v1294_v15 = vpop.f32.mrf.mxu0  ;;  %v1519_v16 = vpop.f32.mrf.mxu1 }
 0x212   : > { %1807 = vst [vmem:[%s2790_s30 + $0x8] sm:$0xff] %v1775_v14  ;;  %v1520_v17 = vadd.f32 %v1519_v16, %v1294_v15 }
 0x213   : > { %v1296_v18 = vpop.f32.mrf.mxu0  ;;  %v1521_v19 = vpop.f32.mrf.mxu1 }
 0x214   : > { %v1776_v20 = vadd.f32 %v2785_v44, %v1520_v17 }
 0x215   : > { %v1299_v21 = vpop.f32.mrf.mxu0  ;;  %v1524_v22 = vpop.f32.mrf.mxu1 }
 0x216   : > { %1808 = vst [vmem:[%s2790_s30 + $0x10] sm:$0xff] %v1776_v20  ;;  %v1525_v23 = vadd.f32 %v1524_v22, %v1299_v21 }
 0x217   : > { %v1301_v24 = vpop.f32.mrf.mxu0  ;;  %v1526_v25 = vpop.f32.mrf.mxu1 }
 0x218   : > { %v1777_v26 = vadd.f32 %v2785_v44, %v1525_v23 }
 0x219   : > { %v1304_v27 = vpop.f32.mrf.mxu0  ;;  %v1529_v28 = vpop.f32.mrf.mxu1 }
 0x21a   : > { %1809 = vst [vmem:[%s2790_s30 + $0x18] sm:$0xff] %v1777_v26  ;;  %v1530_v29 = vadd.f32 %v1529_v28, %v1304_v27 }
 0x21b   : > { %v1306_v30 = vpop.f32.mrf.mxu0  ;;  %v1531_v31 = vpop.f32.mrf.mxu1 }
 0x21c   : > { %v1778_v32 = vadd.f32 %v2785_v44, %v1530_v29 }
 0x21d   : > { %v1309_v33 = vpop.f32.mrf.mxu0  ;;  %v1534_v34 = vpop.f32.mrf.mxu1 }
 0x21e   : > { %1810 = vst [vmem:[%s2790_s30 + $0x20] sm:$0xff] %v1778_v32  ;;  %v1535_v35 = vadd.f32 %v1534_v34, %v1309_v33 }
 0x21f   : > { %v1311_v36 = vpop.f32.mrf.mxu0  ;;  %v1536_v37 = vpop.f32.mrf.mxu1 }
 0x220   : > { %v1779_v38 = vadd.f32 %v2785_v44, %v1535_v35 }
 0x221   : > { %v1314_v39 = vpop.f32.mrf.mxu0  ;;  %v1539_v40 = vpop.f32.mrf.mxu1 }
 0x222   : > { %1811 = vst [vmem:[%s2790_s30 + $0x28] sm:$0xff] %v1779_v38  ;;  %v1540_v41 = vadd.f32 %v1539_v40, %v1314_v39 }
 0x223   : > { %v1316_v46 = vpop.f32.mrf.mxu0  ;;  %v1541_v47 = vpop.f32.mrf.mxu1 }
 0x224   : > { %v1780_v0 = vadd.f32 %v2785_v44, %v1540_v41 }
 0x225   : > { %v1319_v48 = vpop.f32.mrf.mxu0  ;;  %v1544_v49 = vpop.f32.mrf.mxu1 }
 0x226   : > { %1812 = vst [vmem:[%s2790_s30 + $0x30] sm:$0xff] %v1780_v0  ;;  %v1545_v50 = vadd.f32 %v1544_v49, %v1319_v48 }
 0x227   : > { %v1321_v51 = vpop.f32.mrf.mxu0  ;;  %v1546_v52 = vpop.f32.mrf.mxu1 }
 0x228   : > { %v1781_v53 = vadd.f32 %v2785_v44, %v1545_v50 }
 0x229   : > { %v1324_v54 = vpop.f32.mrf.mxu0  ;;  %v1549_v55 = vpop.f32.mrf.mxu1 }
 0x22a   : > { %1813 = vst [vmem:[%s2790_s30 + $0x38] sm:$0xff] %v1781_v53  ;;  %v1550_v56 = vadd.f32 %v1549_v55, %v1324_v54 }
 0x22b   : > { %v1326_v57 = vpop.f32.mrf.mxu0  ;;  %v1551_v58 = vpop.f32.mrf.mxu1 }
 0x22c   : > { %v1782_v59 = vadd.f32 %v2785_v44, %v1550_v56 }
 0x22d   : > { %v1329_v60 = vpop.f32.mrf.mxu0  ;;  %v1554_v61 = vpop.f32.mrf.mxu1 }
 0x22e   : > { %1814 = vst [vmem:[%s2790_s30 + $0x40] sm:$0xff] %v1782_v59  ;;  %v1555_v62 = vadd.f32 %v1554_v61, %v1329_v60 }
 0x22f   : > { %v1331_v63 = vpop.f32.mrf.mxu0  ;;  %v1556_v1 = vpop.f32.mrf.mxu1 }
 0x230   : > { %v1783_v2 = vadd.f32 %v2785_v44, %v1555_v62 }
 0x231   : > { %v1334_v3 = vpop.f32.mrf.mxu0  ;;  %v1559_v4 = vpop.f32.mrf.mxu1 }
 0x232   : > { %1815 = vst [vmem:[%s2790_s30 + $0x48] sm:$0xff] %v1783_v2  ;;  %v1560_v5 = vadd.f32 %v1559_v4, %v1334_v3 }
 0x233   : > { %v1336_v42 = vpop.f32.mrf.mxu0  ;;  %v1561_v43 = vpop.f32.mrf.mxu1 }
 0x234   : > { %v1784_v45 = vadd.f32 %v2785_v44, %v1560_v5 }
 0x235   : > { %v1339_v6 = vpop.f32.mrf.mxu0  ;;  %v1564_v7 = vpop.f32.mrf.mxu1 }
 0x236   : > { %1816 = vst [vmem:[%s2790_s30 + $0x50] sm:$0xff] %v1784_v45  ;;  %v1565_v8 = vadd.f32 %v1564_v7, %v1339_v6 }
 0x237   : > { %v1341_v9 = vpop.f32.mrf.mxu0  ;;  %v1566_v10 = vpop.f32.mrf.mxu1 }
 0x238   : > { %v1785_v11 = vadd.f32 %v2785_v44, %v1565_v8 }
 0x239   : > { %v1344_v12 = vpop.f32.mrf.mxu0  ;;  %v1569_v13 = vpop.f32.mrf.mxu1 }
 0x23a   : > { %1817 = vst [vmem:[%s2790_s30 + $0x58] sm:$0xff] %v1785_v11  ;;  %v1570_v14 = vadd.f32 %v1569_v13, %v1344_v12 }
 0x23b   : > { %v1346_v15 = vpop.f32.mrf.mxu0  ;;  %v1571_v16 = vpop.f32.mrf.mxu1 }
 0x23c   : > { %v1786_v17 = vadd.f32 %v2785_v44, %v1570_v14 }
 0x23d   : > { %v1349_v18 = vpop.f32.mrf.mxu0  ;;  %v1574_v19 = vpop.f32.mrf.mxu1 }
 0x23e   : > { %1818 = vst [vmem:[%s2790_s30 + $0x60] sm:$0xff] %v1786_v17  ;;  %v1575_v20 = vadd.f32 %v1574_v19, %v1349_v18 }
 0x23f   : > { %v1351_v21 = vpop.f32.mrf.mxu0  ;;  %v1576_v22 = vpop.f32.mrf.mxu1 }
 0x240   : > { %v1787_v23 = vadd.f32 %v2785_v44, %v1575_v20 }
 0x241   : > { %v1354_v24 = vpop.f32.mrf.mxu0  ;;  %v1579_v25 = vpop.f32.mrf.mxu1 }
 0x242   : > { %1819 = vst [vmem:[%s2790_s30 + $0x68] sm:$0xff] %v1787_v23  ;;  %v1580_v26 = vadd.f32 %v1579_v25, %v1354_v24 }
 0x243   : > { %v1356_v27 = vpop.f32.mrf.mxu0  ;;  %v1581_v28 = vpop.f32.mrf.mxu1 }
 0x244   : > { %v1788_v29 = vadd.f32 %v2785_v44, %v1580_v26 }
 0x245   : > { %v1359_v30 = vpop.f32.mrf.mxu0  ;;  %v1584_v31 = vpop.f32.mrf.mxu1 }
 0x246   : > { %1820 = vst [vmem:[%s2790_s30 + $0x70] sm:$0xff] %v1788_v29  ;;  %v1585_v32 = vadd.f32 %v1584_v31, %v1359_v30 }
 0x247   : > { %v1361_v33 = vpop.f32.mrf.mxu0  ;;  %v1586_v34 = vpop.f32.mrf.mxu1 }
 0x248   : > { %v1789_v35 = vadd.f32 %v2785_v44, %v1585_v32 }
 0x249   : > { %v1364_v36 = vpop.f32.mrf.mxu0  ;;  %v1589_v37 = vpop.f32.mrf.mxu1 }
 0x24a   : > { %1821 = vst [vmem:[%s2790_s30 + $0x78] sm:$0xff] %v1789_v35  ;;  %v1590_v38 = vadd.f32 %v1589_v37, %v1364_v36 }
 0x24b   : > { %v1366_v39 = vpop.f32.mrf.mxu0  ;;  %v1591_v40 = vpop.f32.mrf.mxu1 }
 0x24c   : > { %v1790_v41 = vadd.f32 %v2785_v44, %v1590_v38 }
 0x24d   : > { %v1369_v46 = vpop.f32.mrf.mxu0  ;;  %v1594_v47 = vpop.f32.mrf.mxu1 }
 0x24e   : > { %1822 = vst [vmem:[%s2790_s30 + $0x80] sm:$0xff] %v1790_v41  ;;  %v1595_v0 = vadd.f32 %v1594_v47, %v1369_v46 }
 0x24f   : > { %v1371_v48 = vpop.f32.mrf.mxu0  ;;  %v1596_v49 = vpop.f32.mrf.mxu1 }
 0x250   : > { %v1791_v50 = vadd.f32 %v2785_v44, %v1595_v0 }
 0x251   : > { %v1374_v51 = vpop.f32.mrf.mxu0  ;;  %v1599_v52 = vpop.f32.mrf.mxu1 }
 0x252   : > { %1823 = vst [vmem:[%s2790_s30 + $0x88] sm:$0xff] %v1791_v50  ;;  %v1600_v53 = vadd.f32 %v1599_v52, %v1374_v51 }
 0x253   : > { %v1376_v54 = vpop.f32.mrf.mxu0  ;;  %v1601_v55 = vpop.f32.mrf.mxu1 }
 0x254   : > { %v1792_v56 = vadd.f32 %v2785_v44, %v1600_v53 }
 0x255   : > { %v1379_v57 = vpop.f32.mrf.mxu0  ;;  %v1604_v58 = vpop.f32.mrf.mxu1 }
 0x256   : > { %1824 = vst [vmem:[%s2790_s30 + $0x90] sm:$0xff] %v1792_v56  ;;  %v1605_v59 = vadd.f32 %v1604_v58, %v1379_v57 }
 0x257   : > { %v1381_v60 = vpop.f32.mrf.mxu0  ;;  %v1606_v61 = vpop.f32.mrf.mxu1 }
 0x258   : > { %v1793_v62 = vadd.f32 %v2785_v44, %v1605_v59 }
 0x259   : > { %v1384_v63 = vpop.f32.mrf.mxu0  ;;  %v1609_v1 = vpop.f32.mrf.mxu1 }
 0x25a   : > { %1825 = vst [vmem:[%s2790_s30 + $0x98] sm:$0xff] %v1793_v62  ;;  %v1610_v2 = vadd.f32 %v1609_v1, %v1384_v63 }
 0x25b   : > { %v1386_v3 = vpop.f32.mrf.mxu0  ;;  %v1611_v4 = vpop.f32.mrf.mxu1 }
 0x25c   : > { %v1794_v5 = vadd.f32 %v2785_v44, %v1610_v2 }
 0x25d   : > { %v1389_v42 = vpop.f32.mrf.mxu0  ;;  %v1614_v43 = vpop.f32.mrf.mxu1 }
 0x25e   : > { %1826 = vst [vmem:[%s2790_s30 + $0xa0] sm:$0xff] %v1794_v5  ;;  %v1615_v45 = vadd.f32 %v1614_v43, %v1389_v42 }
 0x25f   : > { %v1391_v6 = vpop.f32.mrf.mxu0  ;;  %v1616_v7 = vpop.f32.mrf.mxu1 }
 0x260   : > { %v1795_v8 = vadd.f32 %v2785_v44, %v1615_v45 }
 0x261   : > { %v1394_v9 = vpop.f32.mrf.mxu0  ;;  %v1619_v10 = vpop.f32.mrf.mxu1 }
 0x262   : > { %1827 = vst [vmem:[%s2790_s30 + $0xa8] sm:$0xff] %v1795_v8  ;;  %v1620_v11 = vadd.f32 %v1619_v10, %v1394_v9 }
 0x263   : > { %v1396_v12 = vpop.f32.mrf.mxu0  ;;  %v1621_v13 = vpop.f32.mrf.mxu1 }
 0x264   : > { %v1796_v14 = vadd.f32 %v2785_v44, %v1620_v11 }
 0x265   : > { %v1399_v15 = vpop.f32.mrf.mxu0  ;;  %v1624_v16 = vpop.f32.mrf.mxu1 }
 0x266   : > { %1828 = vst [vmem:[%s2790_s30 + $0xb0] sm:$0xff] %v1796_v14  ;;  %v1625_v17 = vadd.f32 %v1624_v16, %v1399_v15 }
 0x267   : > { %v1401_v18 = vpop.f32.mrf.mxu0  ;;  %v1626_v19 = vpop.f32.mrf.mxu1 }
 0x268   : > { %v1797_v20 = vadd.f32 %v2785_v44, %v1625_v17 }
 0x269   : > { %v1404_v21 = vpop.f32.mrf.mxu0  ;;  %v1629_v22 = vpop.f32.mrf.mxu1 }
 0x26a   : > { %1829 = vst [vmem:[%s2790_s30 + $0xb8] sm:$0xff] %v1797_v20  ;;  %v1630_v23 = vadd.f32 %v1629_v22, %v1404_v21 }
 0x26b   : > { %v1406_v24 = vpop.f32.mrf.mxu0  ;;  %v1631_v25 = vpop.f32.mrf.mxu1 }
 0x26c   : > { %v1798_v26 = vadd.f32 %v2785_v44, %v1630_v23 }
 0x26d   : > { %v1409_v27 = vpop.f32.mrf.mxu0  ;;  %v1634_v28 = vpop.f32.mrf.mxu1 }
 0x26e   : > { %1830 = vst [vmem:[%s2790_s30 + $0xc0] sm:$0xff] %v1798_v26  ;;  %v1635_v29 = vadd.f32 %v1634_v28, %v1409_v27 }
 0x26f   : > { %v1411_v30 = vpop.f32.mrf.mxu0  ;;  %v1636_v31 = vpop.f32.mrf.mxu1 }
 0x270   : > { %v1799_v32 = vadd.f32 %v2785_v44, %v1635_v29 }
 0x271   : > { %v1414_v33 = vpop.f32.mrf.mxu0  ;;  %v1639_v34 = vpop.f32.mrf.mxu1 }
 0x272   : > { %1831 = vst [vmem:[%s2790_s30 + $0xc8] sm:$0xff] %v1799_v32  ;;  %v1640_v35 = vadd.f32 %v1639_v34, %v1414_v33 }
 0x273   : > { %v1416_v36 = vpop.f32.mrf.mxu0  ;;  %v1641_v37 = vpop.f32.mrf.mxu1 }
 0x274   : > { %v1800_v38 = vadd.f32 %v2785_v44, %v1640_v35 }
 0x275   : > { %v1419_v39 = vpop.f32.mrf.mxu0  ;;  %v1644_v40 = vpop.f32.mrf.mxu1 }
 0x276   : > { %1832 = vst [vmem:[%s2790_s30 + $0xd0] sm:$0xff] %v1800_v38  ;;  %v1645_v41 = vadd.f32 %v1644_v40, %v1419_v39 }
 0x277   : > { %v1421_v46 = vpop.f32.mrf.mxu0  ;;  %v1646_v47 = vpop.f32.mrf.mxu1 }
 0x278   : > { %v1801_v0 = vadd.f32 %v2785_v44, %v1645_v41 }
 0x279   : > { %v1424_v48 = vpop.f32.mrf.mxu0  ;;  %v1649_v49 = vpop.f32.mrf.mxu1 }
 0x27a   : > { %1833 = vst [vmem:[%s2790_s30 + $0xd8] sm:$0xff] %v1801_v0  ;;  %v1650_v50 = vadd.f32 %v1649_v49, %v1424_v48 }
 0x27b   : > { %v1426_v51 = vpop.f32.mrf.mxu0  ;;  %v1651_v52 = vpop.f32.mrf.mxu1 }
 0x27c   : > { %v1802_v53 = vadd.f32 %v2785_v44, %v1650_v50 }
 0x27d   : > { %v1429_v54 = vpop.f32.mrf.mxu0  ;;  %v1654_v55 = vpop.f32.mrf.mxu1 }
 0x27e   : > { %1834 = vst [vmem:[%s2790_s30 + $0xe0] sm:$0xff] %v1802_v53  ;;  %v1655_v56 = vadd.f32 %v1654_v55, %v1429_v54 }
 0x27f   : > { %v1431_v57 = vpop.f32.mrf.mxu0  ;;  %v1656_v58 = vpop.f32.mrf.mxu1 }
 0x280   : > { %v1803_v59 = vadd.f32 %v2785_v44, %v1655_v56 }
 0x281   : > { %v1434_v60 = vpop.f32.mrf.mxu0  ;;  %v1659_v61 = vpop.f32.mrf.mxu1 }
 0x282   : > { %1835 = vst [vmem:[%s2790_s30 + $0xe8] sm:$0xff] %v1803_v59  ;;  %v1660_v62 = vadd.f32 %v1659_v61, %v1434_v60 }
 0x283   : > { %v1436_v63 = vpop.f32.mrf.mxu0  ;;  %v1661_v1 = vpop.f32.mrf.mxu1 }
 0x284   : > { %v1804_v2 = vadd.f32 %v2785_v44, %v1660_v62 }
 0x285   : > { %v1439_v3 = vpop.f32.mrf.mxu0  ;;  %v1664_v4 = vpop.f32.mrf.mxu1 }
 0x286   : > { %1836 = vst [vmem:[%s2790_s30 + $0xf0] sm:$0xff] %v1804_v2  ;;  %v1665_v5 = vadd.f32 %v1664_v4, %v1439_v3 }
 0x287   : > { %v1441_v42 = vpop.f32.mrf.mxu0  ;;  %v1666_v43 = vpop.f32.mrf.mxu1 }
 0x288   : > { %v1805_v45 = vadd.f32 %v2785_v44, %v1665_v5 }
 0x28a   : > { %1837 = vst [vmem:[%s2790_s30 + $0xf8] sm:$0xff] %v1805_v45 }
 0x28b   : > { %2211 = shalt.err (!%p2208_p13)
}
 0x28c   : > { %s2212_s1 = scalar_lea.hbm %s2858_s17, 4096  ;;  %s2216_s26 = scalar_lea.hbm %s2915_s5, 8192 }
 0x28d   : > { %p2213_p1 = scmp.ne.s32.totalorder %s2858_s17, %s2212_s1  ;;  %p2217_p12 = scmp.lt.s32.totalorder %s2858_s17, %s2915_s5 }
 0x28e   : > { %p2218_p5 = scmp.lt.s32.totalorder %s2216_s26, %s2212_s1 }
 0x28f   : > { %p2214_p4 = pnand %p2213_p1, %p2433_p0 }
 0x290   : > { %p2219_p3 = por %p2218_p5, %p2217_p12 }
 0x291   : > { %p2215_p8 = pneg %p2214_p4 }
 0x293   : > { %p2220_p10 = pnand %p2219_p3, %p2215_p8 }
 0x295   : > { %2223 = shalt.err (!%p2220_p10)
}
 0x296   : > { %s2298_s9 = smov 128   ;;  %s2299_s27 = smov 8  }
 0x297   : > { %2006 = dma.vmem_to_hbm [thread:$0]  (%p2433_p0), %s2860_s10, 4096, %s2858_s17, %s1839_s21, %s2298_s9, %s2298_s9, %s2299_s27  }
 0x298 PF: > { %s1867_s13 = sand.u32 1, %s2266_s18   ;;  %p2937_p2 = scmp.ne.s32.totalorder %s2926_s29, 0 }
 0x299   : > { %p2938_p11 = scmp.ge.s32.totalorder %s2286_s23, 2  ;;  %s1868_s14 = scalar_lea.sflag [#allocation5], %s1867_s13 }
 0x29b   : > { %p2023_p7 = pnand %p2938_p11, %p2937_p2 }
 0x29d   : > { %p2024_p6 = pneg %p2023_p7 }
 0x29f   : > { %2261 = dma.done.wait (%p2024_p6), %s1868_s14, 4096  }
 0x2a0   : > { %2263 = vsyncadd (%p2024_p6), %s1868_s14, 4294963200  ;;  %s23_s23 = sadd.s32 1, %s2286_s23   ;;  %s2939_s18 = smov %s2270_s19 }
 0x2a1   : > { %p20_p9 = scmp.ge.s32.totalorder %s23_s23, 4   ;;  %s2940_s19 = smov %s2274_s20 }
 0x2a2   : > { %s2941_s20 = smov %s2445_s25  ;;  %s2942_s21 = smov %s2282_s22 }
 0x2a3   : > { %s2943_s22 = smov %s2945_s15  ;;  %22 = sbr.rel (!%p20_p9) target bundleno = 10 (0xa), region = 108 }
 0x2a8   :  { %1873 = vsyncpa [#allocation4], 1 }
 0x2a9   :  { %1875 = vsyncpa [#allocation4 + $0x1], 1 }
 0x2aa   :  { %1876 = vsyncpa [#allocation7], 1 }
 0x2ab   :  { %1877 = vsyncpa [#allocation10], 1 }
 0x2ac   :  { %1878 = vsyncpa [#allocation5], 1 }
 0x2ad   :  { %1880 = vsyncpa [#allocation5 + $0x1], 1 }

</bundles_post_ra>
